<compile_context>
chip_gen: v6e
topology: v6e:2x2x1
jax: 0.10.0
libtpu: 0.0.40
codegen_flags: <defaults>
</compile_context>

<pallas_src>
import jax
import jax.numpy as jnp
from jax.experimental import pallas as pl
from jax.experimental.pallas import tpu as pltpu

# ----------------------------- model sizes -----------------------------------
B = 2          # batch per domain
T = 8          # sequence length
V = 32         # vocab size
E = 16         # embedding dim
H = 32         # encoder / decoder GRU hidden size
C = 16         # content dim  (split_nn: state[:, :C])
S = H - C      # style dim    (split_nn: state[:, C:])
MLP_H = 16     # critic / motivator hidden size

B2 = 2 * B            # x and y domains stacked
N_ENC = T * B2        # time-major flattened encoder tokens
N_DEC = (T - 1) * B2  # time-major flattened decoder (teacher-forcing) tokens
H3 = 3 * H

LANE = 128            # TPU lane width
SLAB_W = 2 * LANE     # packed-parameter slab width: enc half | dec half

# ---- packed parameter slab row offsets (8-aligned for the big matmul blocks) --
R_WIH = 0      # rows [0,16)  : W_ih   enc @ lanes [0,96),  dec @ [128,224)
R_GBIAS = 16   # row 16       : b_ih + b_hh(r,z) folded; enc/dec halves
R_BHN = 17     # row 17       : b_hh(n); enc @ [0,32), dec @ [128,160)
R_WHH = 24     # rows [24,56) : W_hh enc @ [0,96), merge_w @ [96,128),
               #                W_hh dec @ [128,224), W_out @ [224,256)
R_EMB = 56     # rows [56,88) : embedding @ [0,16), MLP W1 blockdiag @ [32,64),
               #                MLP W2 blockdiag (lane-padded) @ [64,96)
R_MISC = 88    # row 88       : merge_b @ [0,32), dec_b_out @ [32,64),
               #                mlp_b1 @ [64,96), mlp_b2 (lane-padded) @ [96,128)
N_ROWS = 89

# ---- single fused output slab layout ------------------------------------------
OUT_ROWS = N_DEC + B2        # 32 rows x 128 lanes
O_CONTENT = 32               # rows [28,32): content at lanes [32,48)
O_PRED = 48                  # rows [28,32): critic at lane 48, motivator at 49

_vmem = pl.BlockSpec(memory_space=pltpu.MemorySpace.VMEM)


# ------------------------------ fused kernel ----------------------------------
def _fused_kernel(tok_ref, w_ref, out_ref, hs_ref):
    f32 = jnp.float32

    # Zero the output slab once so unused pad lanes are deterministic.
    out_ref[...] = jnp.zeros((OUT_ROWS, LANE), f32)

    # --- one-hot tokens: lane-major (1, N_ENC) int32 -> (N_ENC, V) f32 --------
    tok = tok_ref[...]                                           # (1, N_ENC)
    iota_v = jax.lax.broadcasted_iota(jnp.int32, (V, N_ENC), 0)
    onehot = jnp.transpose((tok == iota_v).astype(f32))          # (N_ENC, V)

    # --- fused encoder+decoder hoisted input projection ------------------------
    emb = w_ref[R_EMB:R_EMB + V, 0:E]                            # (V, E)
    w_ih_all = w_ref[R_WIH:R_WIH + E, :]                         # (E, 256)
    gate_bias = w_ref[R_GBIAS:R_GBIAS + 1, :]                    # (1, 256)
    proj = jnp.dot(emb, w_ih_all, preferred_element_type=f32)    # (V, 256)
    gi_all = jnp.dot(onehot, proj, preferred_element_type=f32) + gate_bias
    enc_gi = gi_all[:, 0:H3]                                     # (N_ENC, 3H)
    dec_gi = gi_all[:N_DEC, LANE:LANE + H3]                      # (N_DEC, 3H)

    enc_w_hh = w_ref[R_WHH:R_WHH + H, 0:H3]                      # (H, 3H)
    dec_w_hh = w_ref[R_WHH:R_WHH + H, LANE:LANE + H3]            # (H, 3H)
    # Hoisted broadcasts (JAX does not CSE broadcast_in_dim inside the loops).
    enc_bhn = jnp.broadcast_to(w_ref[R_BHN:R_BHN + 1, 0:H], (B2, H))
    dec_bhn = jnp.broadcast_to(w_ref[R_BHN:R_BHN + 1, LANE:LANE + H], (B2, H))

    def gru_step(g, h, w_hh, bhn):
        # PyTorch nn.GRU cell; input-side gates (incl. b_ih and b_hh[r,z]) are
        # pre-folded into `g`.  Only the n-gate hidden bias stays in the loop.
        gh = jnp.dot(h, w_hh, preferred_element_type=f32)        # (B2, 3H)
        # sigmoid(x) == 0.5*(1 + tanh(0.5*x)); one EUP op covers both r and z.
        rz = 0.5 * (1.0 + jnp.tanh(0.5 * (g[:, :2 * H] + gh[:, :2 * H])))
        r = rz[:, :H]
        z = rz[:, H:]
        n = jnp.tanh(g[:, 2 * H:] + r * (gh[:, 2 * H:] + bhn))
        return (1.0 - z) * n + z * h

    # ------------------------------- encoder ----------------------------------
    h = jnp.zeros((B2, H), f32)
    for t in range(T):                                           # fully unrolled
        h = gru_step(enc_gi[t * B2:(t + 1) * B2, :], h, enc_w_hh, enc_bhn)
    state = h                                                    # (B2, H)

    # ------------------- split_nn + merge_nn + critic/motivator ---------------
    merge_w = w_ref[R_WHH:R_WHH + H, H3:H3 + H]                  # (H, H)
    merge_b = w_ref[R_MISC:R_MISC + 1, 0:H]                      # (1, H)
    # Linear on concat(content, style) == Linear on state.
    hid0 = jnp.tanh(jnp.dot(state, merge_w, preferred_element_type=f32)
                    + merge_b)                                   # (B2, H)

    # critic + motivator as ONE block-diagonal 2-layer MLP on the full state.
    mlp_w1 = w_ref[R_EMB:R_EMB + H, 32:32 + 2 * MLP_H]           # (H, 2*MLP_H)
    mlp_b1 = w_ref[R_MISC:R_MISC + 1, 64:64 + 2 * MLP_H]         # (1, 2*MLP_H)
    mlp_w2 = w_ref[R_EMB:R_EMB + 2 * MLP_H, 64:96]               # (2*MLP_H, 32)
    mlp_b2 = w_ref[R_MISC:R_MISC + 1, 96:128]                    # (1, 32)
    mid = jnp.maximum(
        jnp.dot(state, mlp_w1, preferred_element_type=f32) + mlp_b1, 0.0)
    preds = jnp.dot(mid, mlp_w2, preferred_element_type=f32) + mlp_b2  # (B2,32)

    out_ref[N_DEC:OUT_ROWS, O_CONTENT:O_CONTENT + C] = state[:, :C]
    out_ref[N_DEC:OUT_ROWS, O_PRED:O_PRED + 2 * MLP_H] = preds

    # ------------------------------- decoder ----------------------------------
    # Teacher forcing on domain[:, :-1] == first (T-1)*B2 time-major rows.
    h = hid0
    for t in range(T - 1):                                       # fully unrolled
        h = gru_step(dec_gi[t * B2:(t + 1) * B2, :], h, dec_w_hh, dec_bhn)
        hs_ref[t * B2:(t + 1) * B2, :] = h        # collect; off the serial chain

    # Bulk vocab projection: one matmul + one store (not per-step).
    w_out = w_ref[R_WHH:R_WHH + H, 224:224 + V]                  # (H, V)
    b_out = w_ref[R_MISC:R_MISC + 1, H:H + V]                    # (1, V)
    logits = jnp.dot(hs_ref[...], w_out, preferred_element_type=f32) + b_out
    out_ref[0:N_DEC, 0:V] = logits


# ------------------------------ parameter init --------------------------------
def init_params(key):
    ks = jax.random.split(key, 16)
    n = lambda k, shape: (0.1 * jax.random.normal(k, shape)).astype(jnp.float32)
    return {
        "embedding": n(ks[0], (V, E)),
        "enc_w_ih": n(ks[1], (E, 3 * H)),
        "enc_w_hh": n(ks[2], (H, 3 * H)),
        "enc_b_ih": n(ks[3], (1, 3 * H)),
        "enc_b_hh": n(ks[4], (1, 3 * H)),
        "merge_w": n(ks[5], (H, H)),
        "merge_b": n(ks[7], (1, H)),
        "dec_w_ih": n(ks[8], (E, 3 * H)),
        "dec_w_hh": n(ks[9], (H, 3 * H)),
        "dec_b_ih": n(ks[10], (1, 3 * H)),
        "dec_b_hh": n(ks[11], (1, 3 * H)),
        "dec_w_out": n(ks[12], (H, V)),
        "dec_b_out": n(ks[13], (1, V)),
        "critic_w1": n(ks[14], (C, MLP_H)),
        "critic_b1": jnp.zeros((1, MLP_H), jnp.float32),
        "critic_w2": n(ks[15], (MLP_H, 1)),
        "critic_b2": jnp.zeros((1, 1), jnp.float32),
        "motiv_w1": n(jax.random.fold_in(key, 101), (S, MLP_H)),
        "motiv_b1": jnp.zeros((1, MLP_H), jnp.float32),
        "motiv_w2": n(jax.random.fold_in(key, 102), (MLP_H, 1)),
        "motiv_b2": jnp.zeros((1, 1), jnp.float32),
    }


# --------------------------- parameter slab packing ----------------------------
def _pack_params(p):
    f32 = jnp.float32
    slab = jnp.zeros((N_ROWS, SLAB_W), f32)

    # fused input-projection weights (enc half | dec half)
    slab = slab.at[R_WIH:R_WIH + E, 0:H3].set(p["enc_w_ih"])
    slab = slab.at[R_WIH:R_WIH + E, LANE:LANE + H3].set(p["dec_w_ih"])

    # combined gate bias row: b_ih + [b_hh_r, b_hh_z, 0]
    zH = jnp.zeros((1, H), f32)
    enc_gb = p["enc_b_ih"] + jnp.concatenate([p["enc_b_hh"][:, :2 * H], zH], 1)
    dec_gb = p["dec_b_ih"] + jnp.concatenate([p["dec_b_hh"][:, :2 * H], zH], 1)
    slab = slab.at[R_GBIAS, 0:H3].set(enc_gb[0])
    slab = slab.at[R_GBIAS, LANE:LANE + H3].set(dec_gb[0])

    # n-gate hidden biases (stay inside the recurrence, multiplied by r)
    slab = slab.at[R_BHN, 0:H].set(p["enc_b_hh"][0, 2 * H:])
    slab = slab.at[R_BHN, LANE:LANE + H].set(p["dec_b_hh"][0, 2 * H:])

    # recurrence weights + merge_w + vocab projection
    slab = slab.at[R_WHH:R_WHH + H, 0:H3].set(p["enc_w_hh"])
    slab = slab.at[R_WHH:R_WHH + H, H3:H3 + H].set(p["merge_w"])
    slab = slab.at[R_WHH:R_WHH + H, LANE:LANE + H3].set(p["dec_w_hh"])
    slab = slab.at[R_WHH:R_WHH + H, 224:224 + V].set(p["dec_w_out"])

    # embedding + block-diagonal critic/motivator MLP
    slab = slab.at[R_EMB:R_EMB + V, 0:E].set(p["embedding"])
    w1_blk = jnp.zeros((H, 2 * MLP_H), f32)
    w1_blk = w1_blk.at[:C, :MLP_H].set(p["critic_w1"])
    w1_blk = w1_blk.at[C:, MLP_H:].set(p["motiv_w1"])
    slab = slab.at[R_EMB:R_EMB + H, 32:32 + 2 * MLP_H].set(w1_blk)
    w2_blk = jnp.zeros((2 * MLP_H, 32), f32)           # lane-padded to width 32
    w2_blk = w2_blk.at[:MLP_H, 0].set(p["critic_w2"][:, 0])
    w2_blk = w2_blk.at[MLP_H:, 1].set(p["motiv_w2"][:, 0])
    slab = slab.at[R_EMB:R_EMB + 2 * MLP_H, 64:96].set(w2_blk)

    # misc biases
    slab = slab.at[R_MISC, 0:H].set(p["merge_b"][0])
    slab = slab.at[R_MISC, H:H + V].set(p["dec_b_out"][0])
    b1_cat = jnp.concatenate([p["critic_b1"], p["motiv_b1"]], axis=1)
    slab = slab.at[R_MISC, 64:64 + 2 * MLP_H].set(b1_cat[0])
    b2_pad = jnp.zeros((32,), f32)
    b2_pad = b2_pad.at[0].set(p["critic_b2"][0, 0]).at[1].set(p["motiv_b2"][0, 0])
    slab = slab.at[R_MISC, 96:128].set(b2_pad)
    return slab


# ------------------------------ DissoNet forward -------------------------------
def dissonet_forward(params, domain_x, domain_y):
    # Stack the two domains (shared weights) and lay tokens out lane-major,
    # time-major: element n = t*B2 + b.
    tok_all = jnp.concatenate([domain_x, domain_y], axis=0)          # (B2, T)
    tok_lane = jnp.transpose(tok_all, (1, 0)).reshape(1, N_ENC).astype(jnp.int32)
    slab = _pack_params(params)

    out = pl.pallas_call(
        _fused_kernel,
        out_shape=jax.ShapeDtypeStruct((OUT_ROWS, LANE), jnp.float32),
        in_specs=[_vmem, _vmem],
        out_specs=_vmem,
        scratch_shapes=[pltpu.VMEM((N_DEC, H), jnp.float32)],
    )(tok_lane, slab)

    # Tiny wrapper-side slicing / layout fixes back to the PyTorch convention.
    logits_tm = out[:N_DEC, :V]                                       # (28, 32)
    recs_all = jnp.transpose(logits_tm.reshape(T - 1, B2, V), (1, 0, 2))
    content_all = out[N_DEC:, O_CONTENT:O_CONTENT + C]                # (B2, C)
    critic_all = out[N_DEC:, O_PRED:O_PRED + 1]                       # (B2, 1)
    motiv_all = out[N_DEC:, O_PRED + 1:O_PRED + 2]                    # (B2, 1)
    return (recs_all[:B], recs_all[B:], critic_all[:B], critic_all[B:],
            motiv_all[:B], motiv_all[B:], content_all[:B], content_all[B:])


# --------------------------- pure-JAX reference --------------------------------
def _reference_forward(params, domain_x, domain_y):
    emb = params["embedding"]

    def gru_seq(tokens, h0, w_ih, w_hh, b_ih, b_hh):
        x = emb[tokens]                                   # (Bn, Tn, E)
        h = h0
        hs = []
        for t in range(x.shape[1]):
            gi = x[:, t] @ w_ih + b_ih
            gh = h @ w_hh + b_hh
            r = jax.nn.sigmoid(gi[:, :H] + gh[:, :H])
            z = jax.nn.sigmoid(gi[:, H:2 * H] + gh[:, H:2 * H])
            n = jnp.tanh(gi[:, 2 * H:] + r * gh[:, 2 * H:])
            h = (1.0 - z) * n + z * h
            hs.append(h)
        return h, jnp.stack(hs, axis=1)

    def encode(tokens):
        h0 = jnp.zeros((tokens.shape[0], H), jnp.float32)
        h, _ = gru_seq(tokens, h0, params["enc_w_ih"], params["enc_w_hh"],
                       params["enc_b_ih"], params["enc_b_hh"])
        return h

    def decode(hid, tokens):
        _, hs = gru_seq(tokens, hid, params["dec_w_ih"], params["dec_w_hh"],
                        params["dec_b_ih"], params["dec_b_hh"])
        return hs @ params["dec_w_out"] + params["dec_b_out"]

    def mlp(x, w1, b1, w2, b2):
        return jnp.maximum(x @ w1 + b1, 0.0) @ w2 + b2

    state_x, state_y = encode(domain_x), encode(domain_y)
    cx, sx = state_x[:, :C], state_x[:, C:]
    cy, sy = state_y[:, :C], state_y[:, C:]
    hid_x = jnp.tanh(state_x @ params["merge_w"] + params["merge_b"])
    hid_y = jnp.tanh(state_y @ params["merge_w"] + params["merge_b"])
    recs_x = decode(hid_x, domain_x[:, :-1])
    recs_y = decode(hid_y, domain_y[:, :-1])
    crit_x = mlp(cx, params["critic_w1"], params["critic_b1"],
                 params["critic_w2"], params["critic_b2"])
    crit_y = mlp(cy, params["critic_w1"], params["critic_b1"],
                 params["critic_w2"], params["critic_b2"])
    mot_x = mlp(sx, params["motiv_w1"], params["motiv_b1"],
                params["motiv_w2"], params["motiv_b2"])
    mot_y = mlp(sy, params["motiv_w1"], params["motiv_b1"],
                params["motiv_w2"], params["motiv_b2"])
    return (recs_x, recs_y, crit_x, crit_y, mot_x, mot_y, cx, cy)


# ----------------------------------- main --------------------------------------
if __name__ == "__main__":
    key = jax.random.PRNGKey(0)
    params = init_params(key)

    kx, ky = jax.random.split(jax.random.fold_in(key, 7))
    domain_x = jax.random.randint(kx, (B, T), 0, V, dtype=jnp.int32)
    domain_y = jax.random.randint(ky, (B, T), 0, V, dtype=jnp.int32)

    outs = jax.jit(dissonet_forward)(params, domain_x, domain_y)
    outs = jax.block_until_ready(outs)

    # shape sanity (matches PyTorch semantics)
    assert outs[0].shape == (B, T - 1, V) and outs[1].shape == (B, T - 1, V)
    assert outs[2].shape == (B, 1) and outs[3].shape == (B, 1)
    assert outs[4].shape == (B, 1) and outs[5].shape == (B, 1)
    assert outs[6].shape == (B, C) and outs[7].shape == (B, C)

    # numerical check against a pure-JAX reference of the same module
    ref_outs = _reference_forward(params, domain_x, domain_y)
    for got, want in zip(outs, ref_outs):
        assert got.shape == want.shape
        assert float(jnp.max(jnp.abs(got - want))) < 1e-3

    print("KERNEL_OK")
</pallas_src>

<mosaic_0001>
module attributes {stable_mosaic.version = 11 : i64} {
  func.func @_fused_kernel(%arg0: memref<1x32xi32, #tpu.memory_space<vmem>>, %arg1: memref<89x256xf32, #tpu.memory_space<vmem>>, %arg2: memref<32x128xf32, #tpu.memory_space<vmem>>, %arg3: memref<28x32xf32, #tpu.memory_space<vmem>>) attributes {dimension_semantics = [], scalar_prefetch = 0 : i64, scratch_operands = 1 : i64, tpu.core_type = #tpu.core_type<tc>} {
    %cst = arith.constant 0.000000e+00 : f32
    %0 = vector.broadcast %cst : f32 to vector<32x128xf32>
    %c0 = arith.constant 0 : index
    %c0_0 = arith.constant 0 : index
    %1 = vector.load %arg2[%c0, %c0_0] : memref<32x128xf32, #tpu.memory_space<vmem>>, vector<32x128xf32>
    tpu.vector_store %arg2[%c0, %c0_0], %0 {strides = array<i32>} : memref<32x128xf32, #tpu.memory_space<vmem>>, vector<32x128xf32>,
    %c0_1 = arith.constant 0 : index
    %c0_2 = arith.constant 0 : index
    %2 = vector.load %arg0[%c0_1, %c0_2] : memref<1x32xi32, #tpu.memory_space<vmem>>, vector<1x32xi32>
    %3 = tpu.iota {dimensions = array<i32: 0>} : vector<32x32xi32>
    %4 = vector.broadcast %2 : vector<1x32xi32> to vector<32x32xi32>
    %5 = arith.cmpi eq, %4, %3 : vector<32x32xi32>
    %6 = arith.extui %5 : vector<32x32xi1> to vector<32x32xi32>
    %7 = arith.sitofp %6 : vector<32x32xi32> to vector<32x32xf32>
    %8 = tpu.transpose %7, [1, 0] : vector<32x32xf32> -> vector<32x32xf32>
    %c56 = arith.constant 56 : index
    %c0_3 = arith.constant 0 : index
    %9 = vector.load %arg1[%c56, %c0_3] : memref<89x256xf32, #tpu.memory_space<vmem>>, vector<32x16xf32>
    %c0_4 = arith.constant 0 : index
    %c0_5 = arith.constant 0 : index
    %10 = vector.load %arg1[%c0_4, %c0_5] : memref<89x256xf32, #tpu.memory_space<vmem>>, vector<16x256xf32>
    %c16 = arith.constant 16 : index
    %c0_6 = arith.constant 0 : index
    %11 = vector.load %arg1[%c16, %c0_6] : memref<89x256xf32, #tpu.memory_space<vmem>>, vector<1x256xf32>
    %cst_7 = arith.constant dense<0.000000e+00> : vector<32x256xf32>
    %12 = tpu.matmul %9, %10, %cst_7 {dimension_numbers = #tpu.dot_dimension_numbers<[1], [0], [0], [1], [0, 0, 1, 1], [], []>} : vector<32x16xf32>, vector<16x256xf32>, vector<32x256xf32> -> vector<32x256xf32>
    %cst_8 = arith.constant dense<0.000000e+00> : vector<32x256xf32>
    %13 = tpu.matmul %8, %12, %cst_8 {dimension_numbers = #tpu.dot_dimension_numbers<[1], [0], [0], [1], [0, 0, 1, 1], [], []>} : vector<32x32xf32>, vector<32x256xf32>, vector<32x256xf32> -> vector<32x256xf32>
    %14 = vector.broadcast %11 : vector<1x256xf32> to vector<32x256xf32>
    %15 = arith.addf %13, %14 : vector<32x256xf32>
    %16 = vector.extract_strided_slice %15 {offsets = [0, 0], sizes = [32, 96], strides = [1, 1]} : vector<32x256xf32> to vector<32x96xf32>
    %17 = vector.extract_strided_slice %15 {offsets = [0, 128], sizes = [28, 96], strides = [1, 1]} : vector<32x256xf32> to vector<28x96xf32>
    %c24 = arith.constant 24 : index
    %c0_9 = arith.constant 0 : index
    %18 = vector.load %arg1[%c24, %c0_9] : memref<89x256xf32, #tpu.memory_space<vmem>>, vector<32x96xf32>
    %c24_10 = arith.constant 24 : index
    %c128 = arith.constant 128 : index
    %19 = vector.load %arg1[%c24_10, %c128] : memref<89x256xf32, #tpu.memory_space<vmem>>, vector<32x96xf32>
    %c17 = arith.constant 17 : index
    %c0_11 = arith.constant 0 : index
    %20 = vector.load %arg1[%c17, %c0_11] : memref<89x256xf32, #tpu.memory_space<vmem>>, vector<1x32xf32>
    %21 = vector.shape_cast %20 : vector<1x32xf32> to vector<1x32xf32>
    %22 = vector.broadcast %21 : vector<1x32xf32> to vector<4x32xf32>
    %c17_12 = arith.constant 17 : index
    %c128_13 = arith.constant 128 : index
    %23 = vector.load %arg1[%c17_12, %c128_13] : memref<89x256xf32, #tpu.memory_space<vmem>>, vector<1x32xf32>
    %24 = vector.shape_cast %23 : vector<1x32xf32> to vector<1x32xf32>
    %25 = vector.broadcast %24 : vector<1x32xf32> to vector<4x32xf32>
    %cst_14 = arith.constant 0.000000e+00 : f32
    %26 = vector.broadcast %cst_14 : f32 to vector<4x32xf32>
    %27 = vector.extract_strided_slice %16 {offsets = [0, 0], sizes = [4, 96], strides = [1, 1]} : vector<32x96xf32> to vector<4x96xf32>
    %cst_15 = arith.constant dense<0.000000e+00> : vector<4x96xf32>
    %28 = tpu.matmul %26, %18, %cst_15 {dimension_numbers = #tpu.dot_dimension_numbers<[1], [0], [0], [1], [0, 0, 1, 1], [], []>} : vector<4x32xf32>, vector<32x96xf32>, vector<4x96xf32> -> vector<4x96xf32>
    %29 = vector.extract_strided_slice %27 {offsets = [0, 0], sizes = [4, 64], strides = [1, 1]} : vector<4x96xf32> to vector<4x64xf32>
    %30 = vector.extract_strided_slice %28 {offsets = [0, 0], sizes = [4, 64], strides = [1, 1]} : vector<4x96xf32> to vector<4x64xf32>
    %31 = arith.addf %29, %30 : vector<4x64xf32>
    %cst_16 = arith.constant 5.000000e-01 : f32
    %32 = vector.broadcast %cst_16 : f32 to vector<4x64xf32>
    %33 = arith.mulf %32, %31 : vector<4x64xf32>
    %34 = math.tanh %33 : vector<4x64xf32>
    %cst_17 = arith.constant 1.000000e+00 : f32
    %35 = vector.broadcast %cst_17 : f32 to vector<4x64xf32>
    %36 = arith.addf %35, %34 : vector<4x64xf32>
    %cst_18 = arith.constant 5.000000e-01 : f32
    %37 = vector.broadcast %cst_18 : f32 to vector<4x64xf32>
    %38 = arith.mulf %37, %36 : vector<4x64xf32>
    %39 = vector.extract_strided_slice %38 {offsets = [0, 0], sizes = [4, 32], strides = [1, 1]} : vector<4x64xf32> to vector<4x32xf32>
    %40 = vector.extract_strided_slice %38 {offsets = [0, 32], sizes = [4, 32], strides = [1, 1]} : vector<4x64xf32> to vector<4x32xf32>
    %41 = vector.extract_strided_slice %27 {offsets = [0, 64], sizes = [4, 32], strides = [1, 1]} : vector<4x96xf32> to vector<4x32xf32>
    %42 = vector.extract_strided_slice %28 {offsets = [0, 64], sizes = [4, 32], strides = [1, 1]} : vector<4x96xf32> to vector<4x32xf32>
    %43 = arith.addf %42, %22 : vector<4x32xf32>
    %44 = arith.mulf %39, %43 : vector<4x32xf32>
    %45 = arith.addf %41, %44 : vector<4x32xf32>
    %46 = math.tanh %45 : vector<4x32xf32>
    %cst_19 = arith.constant 1.000000e+00 : f32
    %47 = vector.broadcast %cst_19 : f32 to vector<4x32xf32>
    %48 = arith.subf %47, %40 : vector<4x32xf32>
    %49 = arith.mulf %48, %46 : vector<4x32xf32>
    %50 = arith.mulf %40, %26 : vector<4x32xf32>
    %51 = arith.addf %49, %50 : vector<4x32xf32>
    %52 = vector.extract_strided_slice %16 {offsets = [4, 0], sizes = [4, 96], strides = [1, 1]} : vector<32x96xf32> to vector<4x96xf32>
    %cst_20 = arith.constant dense<0.000000e+00> : vector<4x96xf32>
    %53 = tpu.matmul %51, %18, %cst_20 {dimension_numbers = #tpu.dot_dimension_numbers<[1], [0], [0], [1], [0, 0, 1, 1], [], []>} : vector<4x32xf32>, vector<32x96xf32>, vector<4x96xf32> -> vector<4x96xf32>
    %54 = vector.extract_strided_slice %52 {offsets = [0, 0], sizes = [4, 64], strides = [1, 1]} : vector<4x96xf32> to vector<4x64xf32>
    %55 = vector.extract_strided_slice %53 {offsets = [0, 0], sizes = [4, 64], strides = [1, 1]} : vector<4x96xf32> to vector<4x64xf32>
    %56 = arith.addf %54, %55 : vector<4x64xf32>
    %cst_21 = arith.constant 5.000000e-01 : f32
    %57 = vector.broadcast %cst_21 : f32 to vector<4x64xf32>
    %58 = arith.mulf %57, %56 : vector<4x64xf32>
    %59 = math.tanh %58 : vector<4x64xf32>
    %cst_22 = arith.constant 1.000000e+00 : f32
    %60 = vector.broadcast %cst_22 : f32 to vector<4x64xf32>
    %61 = arith.addf %60, %59 : vector<4x64xf32>
    %cst_23 = arith.constant 5.000000e-01 : f32
    %62 = vector.broadcast %cst_23 : f32 to vector<4x64xf32>
    %63 = arith.mulf %62, %61 : vector<4x64xf32>
    %64 = vector.extract_strided_slice %63 {offsets = [0, 0], sizes = [4, 32], strides = [1, 1]} : vector<4x64xf32> to vector<4x32xf32>
    %65 = vector.extract_strided_slice %63 {offsets = [0, 32], sizes = [4, 32], strides = [1, 1]} : vector<4x64xf32> to vector<4x32xf32>
    %66 = vector.extract_strided_slice %52 {offsets = [0, 64], sizes = [4, 32], strides = [1, 1]} : vector<4x96xf32> to vector<4x32xf32>
    %67 = vector.extract_strided_slice %53 {offsets = [0, 64], sizes = [4, 32], strides = [1, 1]} : vector<4x96xf32> to vector<4x32xf32>
    %68 = arith.addf %67, %22 : vector<4x32xf32>
    %69 = arith.mulf %64, %68 : vector<4x32xf32>
    %70 = arith.addf %66, %69 : vector<4x32xf32>
    %71 = math.tanh %70 : vector<4x32xf32>
    %cst_24 = arith.constant 1.000000e+00 : f32
    %72 = vector.broadcast %cst_24 : f32 to vector<4x32xf32>
    %73 = arith.subf %72, %65 : vector<4x32xf32>
    %74 = arith.mulf %73, %71 : vector<4x32xf32>
    %75 = arith.mulf %65, %51 : vector<4x32xf32>
    %76 = arith.addf %74, %75 : vector<4x32xf32>
    %77 = vector.extract_strided_slice %16 {offsets = [8, 0], sizes = [4, 96], strides = [1, 1]} : vector<32x96xf32> to vector<4x96xf32>
    %cst_25 = arith.constant dense<0.000000e+00> : vector<4x96xf32>
    %78 = tpu.matmul %76, %18, %cst_25 {dimension_numbers = #tpu.dot_dimension_numbers<[1], [0], [0], [1], [0, 0, 1, 1], [], []>} : vector<4x32xf32>, vector<32x96xf32>, vector<4x96xf32> -> vector<4x96xf32>
    %79 = vector.extract_strided_slice %77 {offsets = [0, 0], sizes = [4, 64], strides = [1, 1]} : vector<4x96xf32> to vector<4x64xf32>
    %80 = vector.extract_strided_slice %78 {offsets = [0, 0], sizes = [4, 64], strides = [1, 1]} : vector<4x96xf32> to vector<4x64xf32>
    %81 = arith.addf %79, %80 : vector<4x64xf32>
    %cst_26 = arith.constant 5.000000e-01 : f32
    %82 = vector.broadcast %cst_26 : f32 to vector<4x64xf32>
    %83 = arith.mulf %82, %81 : vector<4x64xf32>
    %84 = math.tanh %83 : vector<4x64xf32>
    %cst_27 = arith.constant 1.000000e+00 : f32
    %85 = vector.broadcast %cst_27 : f32 to vector<4x64xf32>
    %86 = arith.addf %85, %84 : vector<4x64xf32>
    %cst_28 = arith.constant 5.000000e-01 : f32
    %87 = vector.broadcast %cst_28 : f32 to vector<4x64xf32>
    %88 = arith.mulf %87, %86 : vector<4x64xf32>
    %89 = vector.extract_strided_slice %88 {offsets = [0, 0], sizes = [4, 32], strides = [1, 1]} : vector<4x64xf32> to vector<4x32xf32>
    %90 = vector.extract_strided_slice %88 {offsets = [0, 32], sizes = [4, 32], strides = [1, 1]} : vector<4x64xf32> to vector<4x32xf32>
    %91 = vector.extract_strided_slice %77 {offsets = [0, 64], sizes = [4, 32], strides = [1, 1]} : vector<4x96xf32> to vector<4x32xf32>
    %92 = vector.extract_strided_slice %78 {offsets = [0, 64], sizes = [4, 32], strides = [1, 1]} : vector<4x96xf32> to vector<4x32xf32>
    %93 = arith.addf %92, %22 : vector<4x32xf32>
    %94 = arith.mulf %89, %93 : vector<4x32xf32>
    %95 = arith.addf %91, %94 : vector<4x32xf32>
    %96 = math.tanh %95 : vector<4x32xf32>
    %cst_29 = arith.constant 1.000000e+00 : f32
    %97 = vector.broadcast %cst_29 : f32 to vector<4x32xf32>
    %98 = arith.subf %97, %90 : vector<4x32xf32>
    %99 = arith.mulf %98, %96 : vector<4x32xf32>
    %100 = arith.mulf %90, %76 : vector<4x32xf32>
    %101 = arith.addf %99, %100 : vector<4x32xf32>
    %102 = vector.extract_strided_slice %16 {offsets = [12, 0], sizes = [4, 96], strides = [1, 1]} : vector<32x96xf32> to vector<4x96xf32>
    %cst_30 = arith.constant dense<0.000000e+00> : vector<4x96xf32>
    %103 = tpu.matmul %101, %18, %cst_30 {dimension_numbers = #tpu.dot_dimension_numbers<[1], [0], [0], [1], [0, 0, 1, 1], [], []>} : vector<4x32xf32>, vector<32x96xf32>, vector<4x96xf32> -> vector<4x96xf32>
    %104 = vector.extract_strided_slice %102 {offsets = [0, 0], sizes = [4, 64], strides = [1, 1]} : vector<4x96xf32> to vector<4x64xf32>
    %105 = vector.extract_strided_slice %103 {offsets = [0, 0], sizes = [4, 64], strides = [1, 1]} : vector<4x96xf32> to vector<4x64xf32>
    %106 = arith.addf %104, %105 : vector<4x64xf32>
    %cst_31 = arith.constant 5.000000e-01 : f32
    %107 = vector.broadcast %cst_31 : f32 to vector<4x64xf32>
    %108 = arith.mulf %107, %106 : vector<4x64xf32>
    %109 = math.tanh %108 : vector<4x64xf32>
    %cst_32 = arith.constant 1.000000e+00 : f32
    %110 = vector.broadcast %cst_32 : f32 to vector<4x64xf32>
    %111 = arith.addf %110, %109 : vector<4x64xf32>
    %cst_33 = arith.constant 5.000000e-01 : f32
    %112 = vector.broadcast %cst_33 : f32 to vector<4x64xf32>
    %113 = arith.mulf %112, %111 : vector<4x64xf32>
    %114 = vector.extract_strided_slice %113 {offsets = [0, 0], sizes = [4, 32], strides = [1, 1]} : vector<4x64xf32> to vector<4x32xf32>
    %115 = vector.extract_strided_slice %113 {offsets = [0, 32], sizes = [4, 32], strides = [1, 1]} : vector<4x64xf32> to vector<4x32xf32>
    %116 = vector.extract_strided_slice %102 {offsets = [0, 64], sizes = [4, 32], strides = [1, 1]} : vector<4x96xf32> to vector<4x32xf32>
    %117 = vector.extract_strided_slice %103 {offsets = [0, 64], sizes = [4, 32], strides = [1, 1]} : vector<4x96xf32> to vector<4x32xf32>
    %118 = arith.addf %117, %22 : vector<4x32xf32>
    %119 = arith.mulf %114, %118 : vector<4x32xf32>
    %120 = arith.addf %116, %119 : vector<4x32xf32>
    %121 = math.tanh %120 : vector<4x32xf32>
    %cst_34 = arith.constant 1.000000e+00 : f32
    %122 = vector.broadcast %cst_34 : f32 to vector<4x32xf32>
    %123 = arith.subf %122, %115 : vector<4x32xf32>
    %124 = arith.mulf %123, %121 : vector<4x32xf32>
    %125 = arith.mulf %115, %101 : vector<4x32xf32>
    %126 = arith.addf %124, %125 : vector<4x32xf32>
    %127 = vector.extract_strided_slice %16 {offsets = [16, 0], sizes = [4, 96], strides = [1, 1]} : vector<32x96xf32> to vector<4x96xf32>
    %cst_35 = arith.constant dense<0.000000e+00> : vector<4x96xf32>
    %128 = tpu.matmul %126, %18, %cst_35 {dimension_numbers = #tpu.dot_dimension_numbers<[1], [0], [0], [1], [0, 0, 1, 1], [], []>} : vector<4x32xf32>, vector<32x96xf32>, vector<4x96xf32> -> vector<4x96xf32>
    %129 = vector.extract_strided_slice %127 {offsets = [0, 0], sizes = [4, 64], strides = [1, 1]} : vector<4x96xf32> to vector<4x64xf32>
    %130 = vector.extract_strided_slice %128 {offsets = [0, 0], sizes = [4, 64], strides = [1, 1]} : vector<4x96xf32> to vector<4x64xf32>
    %131 = arith.addf %129, %130 : vector<4x64xf32>
    %cst_36 = arith.constant 5.000000e-01 : f32
    %132 = vector.broadcast %cst_36 : f32 to vector<4x64xf32>
    %133 = arith.mulf %132, %131 : vector<4x64xf32>
    %134 = math.tanh %133 : vector<4x64xf32>
    %cst_37 = arith.constant 1.000000e+00 : f32
    %135 = vector.broadcast %cst_37 : f32 to vector<4x64xf32>
    %136 = arith.addf %135, %134 : vector<4x64xf32>
    %cst_38 = arith.constant 5.000000e-01 : f32
    %137 = vector.broadcast %cst_38 : f32 to vector<4x64xf32>
    %138 = arith.mulf %137, %136 : vector<4x64xf32>
    %139 = vector.extract_strided_slice %138 {offsets = [0, 0], sizes = [4, 32], strides = [1, 1]} : vector<4x64xf32> to vector<4x32xf32>
    %140 = vector.extract_strided_slice %138 {offsets = [0, 32], sizes = [4, 32], strides = [1, 1]} : vector<4x64xf32> to vector<4x32xf32>
    %141 = vector.extract_strided_slice %127 {offsets = [0, 64], sizes = [4, 32], strides = [1, 1]} : vector<4x96xf32> to vector<4x32xf32>
    %142 = vector.extract_strided_slice %128 {offsets = [0, 64], sizes = [4, 32], strides = [1, 1]} : vector<4x96xf32> to vector<4x32xf32>
    %143 = arith.addf %142, %22 : vector<4x32xf32>
    %144 = arith.mulf %139, %143 : vector<4x32xf32>
    %145 = arith.addf %141, %144 : vector<4x32xf32>
    %146 = math.tanh %145 : vector<4x32xf32>
    %cst_39 = arith.constant 1.000000e+00 : f32
    %147 = vector.broadcast %cst_39 : f32 to vector<4x32xf32>
    %148 = arith.subf %147, %140 : vector<4x32xf32>
    %149 = arith.mulf %148, %146 : vector<4x32xf32>
    %150 = arith.mulf %140, %126 : vector<4x32xf32>
    %151 = arith.addf %149, %150 : vector<4x32xf32>
    %152 = vector.extract_strided_slice %16 {offsets = [20, 0], sizes = [4, 96], strides = [1, 1]} : vector<32x96xf32> to vector<4x96xf32>
    %cst_40 = arith.constant dense<0.000000e+00> : vector<4x96xf32>
    %153 = tpu.matmul %151, %18, %cst_40 {dimension_numbers = #tpu.dot_dimension_numbers<[1], [0], [0], [1], [0, 0, 1, 1], [], []>} : vector<4x32xf32>, vector<32x96xf32>, vector<4x96xf32> -> vector<4x96xf32>
    %154 = vector.extract_strided_slice %152 {offsets = [0, 0], sizes = [4, 64], strides = [1, 1]} : vector<4x96xf32> to vector<4x64xf32>
    %155 = vector.extract_strided_slice %153 {offsets = [0, 0], sizes = [4, 64], strides = [1, 1]} : vector<4x96xf32> to vector<4x64xf32>
    %156 = arith.addf %154, %155 : vector<4x64xf32>
    %cst_41 = arith.constant 5.000000e-01 : f32
    %157 = vector.broadcast %cst_41 : f32 to vector<4x64xf32>
    %158 = arith.mulf %157, %156 : vector<4x64xf32>
    %159 = math.tanh %158 : vector<4x64xf32>
    %cst_42 = arith.constant 1.000000e+00 : f32
    %160 = vector.broadcast %cst_42 : f32 to vector<4x64xf32>
    %161 = arith.addf %160, %159 : vector<4x64xf32>
    %cst_43 = arith.constant 5.000000e-01 : f32
    %162 = vector.broadcast %cst_43 : f32 to vector<4x64xf32>
    %163 = arith.mulf %162, %161 : vector<4x64xf32>
    %164 = vector.extract_strided_slice %163 {offsets = [0, 0], sizes = [4, 32], strides = [1, 1]} : vector<4x64xf32> to vector<4x32xf32>
    %165 = vector.extract_strided_slice %163 {offsets = [0, 32], sizes = [4, 32], strides = [1, 1]} : vector<4x64xf32> to vector<4x32xf32>
    %166 = vector.extract_strided_slice %152 {offsets = [0, 64], sizes = [4, 32], strides = [1, 1]} : vector<4x96xf32> to vector<4x32xf32>
    %167 = vector.extract_strided_slice %153 {offsets = [0, 64], sizes = [4, 32], strides = [1, 1]} : vector<4x96xf32> to vector<4x32xf32>
    %168 = arith.addf %167, %22 : vector<4x32xf32>
    %169 = arith.mulf %164, %168 : vector<4x32xf32>
    %170 = arith.addf %166, %169 : vector<4x32xf32>
    %171 = math.tanh %170 : vector<4x32xf32>
    %cst_44 = arith.constant 1.000000e+00 : f32
    %172 = vector.broadcast %cst_44 : f32 to vector<4x32xf32>
    %173 = arith.subf %172, %165 : vector<4x32xf32>
    %174 = arith.mulf %173, %171 : vector<4x32xf32>
    %175 = arith.mulf %165, %151 : vector<4x32xf32>
    %176 = arith.addf %174, %175 : vector<4x32xf32>
    %177 = vector.extract_strided_slice %16 {offsets = [24, 0], sizes = [4, 96], strides = [1, 1]} : vector<32x96xf32> to vector<4x96xf32>
    %cst_45 = arith.constant dense<0.000000e+00> : vector<4x96xf32>
    %178 = tpu.matmul %176, %18, %cst_45 {dimension_numbers = #tpu.dot_dimension_numbers<[1], [0], [0], [1], [0, 0, 1, 1], [], []>} : vector<4x32xf32>, vector<32x96xf32>, vector<4x96xf32> -> vector<4x96xf32>
    %179 = vector.extract_strided_slice %177 {offsets = [0, 0], sizes = [4, 64], strides = [1, 1]} : vector<4x96xf32> to vector<4x64xf32>
    %180 = vector.extract_strided_slice %178 {offsets = [0, 0], sizes = [4, 64], strides = [1, 1]} : vector<4x96xf32> to vector<4x64xf32>
    %181 = arith.addf %179, %180 : vector<4x64xf32>
    %cst_46 = arith.constant 5.000000e-01 : f32
    %182 = vector.broadcast %cst_46 : f32 to vector<4x64xf32>
    %183 = arith.mulf %182, %181 : vector<4x64xf32>
    %184 = math.tanh %183 : vector<4x64xf32>
    %cst_47 = arith.constant 1.000000e+00 : f32
    %185 = vector.broadcast %cst_47 : f32 to vector<4x64xf32>
    %186 = arith.addf %185, %184 : vector<4x64xf32>
    %cst_48 = arith.constant 5.000000e-01 : f32
    %187 = vector.broadcast %cst_48 : f32 to vector<4x64xf32>
    %188 = arith.mulf %187, %186 : vector<4x64xf32>
    %189 = vector.extract_strided_slice %188 {offsets = [0, 0], sizes = [4, 32], strides = [1, 1]} : vector<4x64xf32> to vector<4x32xf32>
    %190 = vector.extract_strided_slice %188 {offsets = [0, 32], sizes = [4, 32], strides = [1, 1]} : vector<4x64xf32> to vector<4x32xf32>
    %191 = vector.extract_strided_slice %177 {offsets = [0, 64], sizes = [4, 32], strides = [1, 1]} : vector<4x96xf32> to vector<4x32xf32>
    %192 = vector.extract_strided_slice %178 {offsets = [0, 64], sizes = [4, 32], strides = [1, 1]} : vector<4x96xf32> to vector<4x32xf32>
    %193 = arith.addf %192, %22 : vector<4x32xf32>
    %194 = arith.mulf %189, %193 : vector<4x32xf32>
    %195 = arith.addf %191, %194 : vector<4x32xf32>
    %196 = math.tanh %195 : vector<4x32xf32>
    %cst_49 = arith.constant 1.000000e+00 : f32
    %197 = vector.broadcast %cst_49 : f32 to vector<4x32xf32>
    %198 = arith.subf %197, %190 : vector<4x32xf32>
    %199 = arith.mulf %198, %196 : vector<4x32xf32>
    %200 = arith.mulf %190, %176 : vector<4x32xf32>
    %201 = arith.addf %199, %200 : vector<4x32xf32>
    %202 = vector.extract_strided_slice %16 {offsets = [28, 0], sizes = [4, 96], strides = [1, 1]} : vector<32x96xf32> to vector<4x96xf32>
    %cst_50 = arith.constant dense<0.000000e+00> : vector<4x96xf32>
    %203 = tpu.matmul %201, %18, %cst_50 {dimension_numbers = #tpu.dot_dimension_numbers<[1], [0], [0], [1], [0, 0, 1, 1], [], []>} : vector<4x32xf32>, vector<32x96xf32>, vector<4x96xf32> -> vector<4x96xf32>
    %204 = vector.extract_strided_slice %202 {offsets = [0, 0], sizes = [4, 64], strides = [1, 1]} : vector<4x96xf32> to vector<4x64xf32>
    %205 = vector.extract_strided_slice %203 {offsets = [0, 0], sizes = [4, 64], strides = [1, 1]} : vector<4x96xf32> to vector<4x64xf32>
    %206 = arith.addf %204, %205 : vector<4x64xf32>
    %cst_51 = arith.constant 5.000000e-01 : f32
    %207 = vector.broadcast %cst_51 : f32 to vector<4x64xf32>
    %208 = arith.mulf %207, %206 : vector<4x64xf32>
    %209 = math.tanh %208 : vector<4x64xf32>
    %cst_52 = arith.constant 1.000000e+00 : f32
    %210 = vector.broadcast %cst_52 : f32 to vector<4x64xf32>
    %211 = arith.addf %210, %209 : vector<4x64xf32>
    %cst_53 = arith.constant 5.000000e-01 : f32
    %212 = vector.broadcast %cst_53 : f32 to vector<4x64xf32>
    %213 = arith.mulf %212, %211 : vector<4x64xf32>
    %214 = vector.extract_strided_slice %213 {offsets = [0, 0], sizes = [4, 32], strides = [1, 1]} : vector<4x64xf32> to vector<4x32xf32>
    %215 = vector.extract_strided_slice %213 {offsets = [0, 32], sizes = [4, 32], strides = [1, 1]} : vector<4x64xf32> to vector<4x32xf32>
    %216 = vector.extract_strided_slice %202 {offsets = [0, 64], sizes = [4, 32], strides = [1, 1]} : vector<4x96xf32> to vector<4x32xf32>
    %217 = vector.extract_strided_slice %203 {offsets = [0, 64], sizes = [4, 32], strides = [1, 1]} : vector<4x96xf32> to vector<4x32xf32>
    %218 = arith.addf %217, %22 : vector<4x32xf32>
    %219 = arith.mulf %214, %218 : vector<4x32xf32>
    %220 = arith.addf %216, %219 : vector<4x32xf32>
    %221 = math.tanh %220 : vector<4x32xf32>
    %cst_54 = arith.constant 1.000000e+00 : f32
    %222 = vector.broadcast %cst_54 : f32 to vector<4x32xf32>
    %223 = arith.subf %222, %215 : vector<4x32xf32>
    %224 = arith.mulf %223, %221 : vector<4x32xf32>
    %225 = arith.mulf %215, %201 : vector<4x32xf32>
    %226 = arith.addf %224, %225 : vector<4x32xf32>
    %c24_55 = arith.constant 24 : index
    %c96 = arith.constant 96 : index
    %227 = vector.load %arg1[%c24_55, %c96] : memref<89x256xf32, #tpu.memory_space<vmem>>, vector<32x32xf32>
    %c88 = arith.constant 88 : index
    %c0_56 = arith.constant 0 : index
    %228 = vector.load %arg1[%c88, %c0_56] : memref<89x256xf32, #tpu.memory_space<vmem>>, vector<1x32xf32>
    %cst_57 = arith.constant dense<0.000000e+00> : vector<4x32xf32>
    %229 = tpu.matmul %226, %227, %cst_57 {dimension_numbers = #tpu.dot_dimension_numbers<[1], [0], [0], [1], [0, 0, 1, 1], [], []>} : vector<4x32xf32>, vector<32x32xf32>, vector<4x32xf32> -> vector<4x32xf32>
    %230 = vector.broadcast %228 : vector<1x32xf32> to vector<4x32xf32>
    %231 = arith.addf %229, %230 : vector<4x32xf32>
    %232 = math.tanh %231 : vector<4x32xf32>
    %c56_58 = arith.constant 56 : index
    %c32 = arith.constant 32 : index
    %233 = vector.load %arg1[%c56_58, %c32] : memref<89x256xf32, #tpu.memory_space<vmem>>, vector<32x32xf32>
    %c88_59 = arith.constant 88 : index
    %c64 = arith.constant 64 : index
    %234 = vector.load %arg1[%c88_59, %c64] : memref<89x256xf32, #tpu.memory_space<vmem>>, vector<1x32xf32>
    %c56_60 = arith.constant 56 : index
    %c64_61 = arith.constant 64 : index
    %235 = vector.load %arg1[%c56_60, %c64_61] : memref<89x256xf32, #tpu.memory_space<vmem>>, vector<32x32xf32>
    %c88_62 = arith.constant 88 : index
    %c96_63 = arith.constant 96 : index
    %236 = vector.load %arg1[%c88_62, %c96_63] : memref<89x256xf32, #tpu.memory_space<vmem>>, vector<1x32xf32>
    %cst_64 = arith.constant dense<0.000000e+00> : vector<4x32xf32>
    %237 = tpu.matmul %226, %233, %cst_64 {dimension_numbers = #tpu.dot_dimension_numbers<[1], [0], [0], [1], [0, 0, 1, 1], [], []>} : vector<4x32xf32>, vector<32x32xf32>, vector<4x32xf32> -> vector<4x32xf32>
    %238 = vector.broadcast %234 : vector<1x32xf32> to vector<4x32xf32>
    %239 = arith.addf %237, %238 : vector<4x32xf32>
    %cst_65 = arith.constant 0.000000e+00 : f32
    %240 = vector.broadcast %cst_65 : f32 to vector<4x32xf32>
    %241 = arith.maximumf %239, %240 : vector<4x32xf32>
    %cst_66 = arith.constant dense<0.000000e+00> : vector<4x32xf32>
    %242 = tpu.matmul %241, %235, %cst_66 {dimension_numbers = #tpu.dot_dimension_numbers<[1], [0], [0], [1], [0, 0, 1, 1], [], []>} : vector<4x32xf32>, vector<32x32xf32>, vector<4x32xf32> -> vector<4x32xf32>
    %243 = vector.broadcast %236 : vector<1x32xf32> to vector<4x32xf32>
    %244 = arith.addf %242, %243 : vector<4x32xf32>
    %245 = vector.extract_strided_slice %226 {offsets = [0, 0], sizes = [4, 16], strides = [1, 1]} : vector<4x32xf32> to vector<4x16xf32>
    %c28 = arith.constant 28 : index
    %c32_67 = arith.constant 32 : index
    %246 = vector.load %arg2[%c28, %c32_67] : memref<32x128xf32, #tpu.memory_space<vmem>>, vector<4x16xf32>
    tpu.vector_store %arg2[%c28, %c32_67], %245 {strides = array<i32>} : memref<32x128xf32, #tpu.memory_space<vmem>>, vector<4x16xf32>,
    %c28_68 = arith.constant 28 : index
    %c48 = arith.constant 48 : index
    %247 = vector.load %arg2[%c28_68, %c48] : memref<32x128xf32, #tpu.memory_space<vmem>>, vector<4x32xf32>
    tpu.vector_store %arg2[%c28_68, %c48], %244 {strides = array<i32>} : memref<32x128xf32, #tpu.memory_space<vmem>>, vector<4x32xf32>,
    %248 = vector.extract_strided_slice %17 {offsets = [0, 0], sizes = [4, 96], strides = [1, 1]} : vector<28x96xf32> to vector<4x96xf32>
    %cst_69 = arith.constant dense<0.000000e+00> : vector<4x96xf32>
    %249 = tpu.matmul %232, %19, %cst_69 {dimension_numbers = #tpu.dot_dimension_numbers<[1], [0], [0], [1], [0, 0, 1, 1], [], []>} : vector<4x32xf32>, vector<32x96xf32>, vector<4x96xf32> -> vector<4x96xf32>
    %250 = vector.extract_strided_slice %248 {offsets = [0, 0], sizes = [4, 64], strides = [1, 1]} : vector<4x96xf32> to vector<4x64xf32>
    %251 = vector.extract_strided_slice %249 {offsets = [0, 0], sizes = [4, 64], strides = [1, 1]} : vector<4x96xf32> to vector<4x64xf32>
    %252 = arith.addf %250, %251 : vector<4x64xf32>
    %cst_70 = arith.constant 5.000000e-01 : f32
    %253 = vector.broadcast %cst_70 : f32 to vector<4x64xf32>
    %254 = arith.mulf %253, %252 : vector<4x64xf32>
    %255 = math.tanh %254 : vector<4x64xf32>
    %cst_71 = arith.constant 1.000000e+00 : f32
    %256 = vector.broadcast %cst_71 : f32 to vector<4x64xf32>
    %257 = arith.addf %256, %255 : vector<4x64xf32>
    %cst_72 = arith.constant 5.000000e-01 : f32
    %258 = vector.broadcast %cst_72 : f32 to vector<4x64xf32>
    %259 = arith.mulf %258, %257 : vector<4x64xf32>
    %260 = vector.extract_strided_slice %259 {offsets = [0, 0], sizes = [4, 32], strides = [1, 1]} : vector<4x64xf32> to vector<4x32xf32>
    %261 = vector.extract_strided_slice %259 {offsets = [0, 32], sizes = [4, 32], strides = [1, 1]} : vector<4x64xf32> to vector<4x32xf32>
    %262 = vector.extract_strided_slice %248 {offsets = [0, 64], sizes = [4, 32], strides = [1, 1]} : vector<4x96xf32> to vector<4x32xf32>
    %263 = vector.extract_strided_slice %249 {offsets = [0, 64], sizes = [4, 32], strides = [1, 1]} : vector<4x96xf32> to vector<4x32xf32>
    %264 = arith.addf %263, %25 : vector<4x32xf32>
    %265 = arith.mulf %260, %264 : vector<4x32xf32>
    %266 = arith.addf %262, %265 : vector<4x32xf32>
    %267 = math.tanh %266 : vector<4x32xf32>
    %cst_73 = arith.constant 1.000000e+00 : f32
    %268 = vector.broadcast %cst_73 : f32 to vector<4x32xf32>
    %269 = arith.subf %268, %261 : vector<4x32xf32>
    %270 = arith.mulf %269, %267 : vector<4x32xf32>
    %271 = arith.mulf %261, %232 : vector<4x32xf32>
    %272 = arith.addf %270, %271 : vector<4x32xf32>
    %c0_74 = arith.constant 0 : index
    %c0_75 = arith.constant 0 : index
    %273 = vector.load %arg3[%c0_74, %c0_75] : memref<28x32xf32, #tpu.memory_space<vmem>>, vector<4x32xf32>
    tpu.vector_store %arg3[%c0_74, %c0_75], %272 {strides = array<i32>} : memref<28x32xf32, #tpu.memory_space<vmem>>, vector<4x32xf32>,
    %274 = vector.extract_strided_slice %17 {offsets = [4, 0], sizes = [4, 96], strides = [1, 1]} : vector<28x96xf32> to vector<4x96xf32>
    %cst_76 = arith.constant dense<0.000000e+00> : vector<4x96xf32>
    %275 = tpu.matmul %272, %19, %cst_76 {dimension_numbers = #tpu.dot_dimension_numbers<[1], [0], [0], [1], [0, 0, 1, 1], [], []>} : vector<4x32xf32>, vector<32x96xf32>, vector<4x96xf32> -> vector<4x96xf32>
    %276 = vector.extract_strided_slice %274 {offsets = [0, 0], sizes = [4, 64], strides = [1, 1]} : vector<4x96xf32> to vector<4x64xf32>
    %277 = vector.extract_strided_slice %275 {offsets = [0, 0], sizes = [4, 64], strides = [1, 1]} : vector<4x96xf32> to vector<4x64xf32>
    %278 = arith.addf %276, %277 : vector<4x64xf32>
    %cst_77 = arith.constant 5.000000e-01 : f32
    %279 = vector.broadcast %cst_77 : f32 to vector<4x64xf32>
    %280 = arith.mulf %279, %278 : vector<4x64xf32>
    %281 = math.tanh %280 : vector<4x64xf32>
    %cst_78 = arith.constant 1.000000e+00 : f32
    %282 = vector.broadcast %cst_78 : f32 to vector<4x64xf32>
    %283 = arith.addf %282, %281 : vector<4x64xf32>
    %cst_79 = arith.constant 5.000000e-01 : f32
    %284 = vector.broadcast %cst_79 : f32 to vector<4x64xf32>
    %285 = arith.mulf %284, %283 : vector<4x64xf32>
    %286 = vector.extract_strided_slice %285 {offsets = [0, 0], sizes = [4, 32], strides = [1, 1]} : vector<4x64xf32> to vector<4x32xf32>
    %287 = vector.extract_strided_slice %285 {offsets = [0, 32], sizes = [4, 32], strides = [1, 1]} : vector<4x64xf32> to vector<4x32xf32>
    %288 = vector.extract_strided_slice %274 {offsets = [0, 64], sizes = [4, 32], strides = [1, 1]} : vector<4x96xf32> to vector<4x32xf32>
    %289 = vector.extract_strided_slice %275 {offsets = [0, 64], sizes = [4, 32], strides = [1, 1]} : vector<4x96xf32> to vector<4x32xf32>
    %290 = arith.addf %289, %25 : vector<4x32xf32>
    %291 = arith.mulf %286, %290 : vector<4x32xf32>
    %292 = arith.addf %288, %291 : vector<4x32xf32>
    %293 = math.tanh %292 : vector<4x32xf32>
    %cst_80 = arith.constant 1.000000e+00 : f32
    %294 = vector.broadcast %cst_80 : f32 to vector<4x32xf32>
    %295 = arith.subf %294, %287 : vector<4x32xf32>
    %296 = arith.mulf %295, %293 : vector<4x32xf32>
    %297 = arith.mulf %287, %272 : vector<4x32xf32>
    %298 = arith.addf %296, %297 : vector<4x32xf32>
    %c4 = arith.constant 4 : index
    %c0_81 = arith.constant 0 : index
    %299 = vector.load %arg3[%c4, %c0_81] : memref<28x32xf32, #tpu.memory_space<vmem>>, vector<4x32xf32>
    tpu.vector_store %arg3[%c4, %c0_81], %298 {strides = array<i32>} : memref<28x32xf32, #tpu.memory_space<vmem>>, vector<4x32xf32>,
    %300 = vector.extract_strided_slice %17 {offsets = [8, 0], sizes = [4, 96], strides = [1, 1]} : vector<28x96xf32> to vector<4x96xf32>
    %cst_82 = arith.constant dense<0.000000e+00> : vector<4x96xf32>
    %301 = tpu.matmul %298, %19, %cst_82 {dimension_numbers = #tpu.dot_dimension_numbers<[1], [0], [0], [1], [0, 0, 1, 1], [], []>} : vector<4x32xf32>, vector<32x96xf32>, vector<4x96xf32> -> vector<4x96xf32>
    %302 = vector.extract_strided_slice %300 {offsets = [0, 0], sizes = [4, 64], strides = [1, 1]} : vector<4x96xf32> to vector<4x64xf32>
    %303 = vector.extract_strided_slice %301 {offsets = [0, 0], sizes = [4, 64], strides = [1, 1]} : vector<4x96xf32> to vector<4x64xf32>
    %304 = arith.addf %302, %303 : vector<4x64xf32>
    %cst_83 = arith.constant 5.000000e-01 : f32
    %305 = vector.broadcast %cst_83 : f32 to vector<4x64xf32>
    %306 = arith.mulf %305, %304 : vector<4x64xf32>
    %307 = math.tanh %306 : vector<4x64xf32>
    %cst_84 = arith.constant 1.000000e+00 : f32
    %308 = vector.broadcast %cst_84 : f32 to vector<4x64xf32>
    %309 = arith.addf %308, %307 : vector<4x64xf32>
    %cst_85 = arith.constant 5.000000e-01 : f32
    %310 = vector.broadcast %cst_85 : f32 to vector<4x64xf32>
    %311 = arith.mulf %310, %309 : vector<4x64xf32>
    %312 = vector.extract_strided_slice %311 {offsets = [0, 0], sizes = [4, 32], strides = [1, 1]} : vector<4x64xf32> to vector<4x32xf32>
    %313 = vector.extract_strided_slice %311 {offsets = [0, 32], sizes = [4, 32], strides = [1, 1]} : vector<4x64xf32> to vector<4x32xf32>
    %314 = vector.extract_strided_slice %300 {offsets = [0, 64], sizes = [4, 32], strides = [1, 1]} : vector<4x96xf32> to vector<4x32xf32>
    %315 = vector.extract_strided_slice %301 {offsets = [0, 64], sizes = [4, 32], strides = [1, 1]} : vector<4x96xf32> to vector<4x32xf32>
    %316 = arith.addf %315, %25 : vector<4x32xf32>
    %317 = arith.mulf %312, %316 : vector<4x32xf32>
    %318 = arith.addf %314, %317 : vector<4x32xf32>
    %319 = math.tanh %318 : vector<4x32xf32>
    %cst_86 = arith.constant 1.000000e+00 : f32
    %320 = vector.broadcast %cst_86 : f32 to vector<4x32xf32>
    %321 = arith.subf %320, %313 : vector<4x32xf32>
    %322 = arith.mulf %321, %319 : vector<4x32xf32>
    %323 = arith.mulf %313, %298 : vector<4x32xf32>
    %324 = arith.addf %322, %323 : vector<4x32xf32>
    %c8 = arith.constant 8 : index
    %c0_87 = arith.constant 0 : index
    %325 = vector.load %arg3[%c8, %c0_87] : memref<28x32xf32, #tpu.memory_space<vmem>>, vector<4x32xf32>
    tpu.vector_store %arg3[%c8, %c0_87], %324 {strides = array<i32>} : memref<28x32xf32, #tpu.memory_space<vmem>>, vector<4x32xf32>,
    %326 = vector.extract_strided_slice %17 {offsets = [12, 0], sizes = [4, 96], strides = [1, 1]} : vector<28x96xf32> to vector<4x96xf32>
    %cst_88 = arith.constant dense<0.000000e+00> : vector<4x96xf32>
    %327 = tpu.matmul %324, %19, %cst_88 {dimension_numbers = #tpu.dot_dimension_numbers<[1], [0], [0], [1], [0, 0, 1, 1], [], []>} : vector<4x32xf32>, vector<32x96xf32>, vector<4x96xf32> -> vector<4x96xf32>
    %328 = vector.extract_strided_slice %326 {offsets = [0, 0], sizes = [4, 64], strides = [1, 1]} : vector<4x96xf32> to vector<4x64xf32>
    %329 = vector.extract_strided_slice %327 {offsets = [0, 0], sizes = [4, 64], strides = [1, 1]} : vector<4x96xf32> to vector<4x64xf32>
    %330 = arith.addf %328, %329 : vector<4x64xf32>
    %cst_89 = arith.constant 5.000000e-01 : f32
    %331 = vector.broadcast %cst_89 : f32 to vector<4x64xf32>
    %332 = arith.mulf %331, %330 : vector<4x64xf32>
    %333 = math.tanh %332 : vector<4x64xf32>
    %cst_90 = arith.constant 1.000000e+00 : f32
    %334 = vector.broadcast %cst_90 : f32 to vector<4x64xf32>
    %335 = arith.addf %334, %333 : vector<4x64xf32>
    %cst_91 = arith.constant 5.000000e-01 : f32
    %336 = vector.broadcast %cst_91 : f32 to vector<4x64xf32>
    %337 = arith.mulf %336, %335 : vector<4x64xf32>
    %338 = vector.extract_strided_slice %337 {offsets = [0, 0], sizes = [4, 32], strides = [1, 1]} : vector<4x64xf32> to vector<4x32xf32>
    %339 = vector.extract_strided_slice %337 {offsets = [0, 32], sizes = [4, 32], strides = [1, 1]} : vector<4x64xf32> to vector<4x32xf32>
    %340 = vector.extract_strided_slice %326 {offsets = [0, 64], sizes = [4, 32], strides = [1, 1]} : vector<4x96xf32> to vector<4x32xf32>
    %341 = vector.extract_strided_slice %327 {offsets = [0, 64], sizes = [4, 32], strides = [1, 1]} : vector<4x96xf32> to vector<4x32xf32>
    %342 = arith.addf %341, %25 : vector<4x32xf32>
    %343 = arith.mulf %338, %342 : vector<4x32xf32>
    %344 = arith.addf %340, %343 : vector<4x32xf32>
    %345 = math.tanh %344 : vector<4x32xf32>
    %cst_92 = arith.constant 1.000000e+00 : f32
    %346 = vector.broadcast %cst_92 : f32 to vector<4x32xf32>
    %347 = arith.subf %346, %339 : vector<4x32xf32>
    %348 = arith.mulf %347, %345 : vector<4x32xf32>
    %349 = arith.mulf %339, %324 : vector<4x32xf32>
    %350 = arith.addf %348, %349 : vector<4x32xf32>
    %c12 = arith.constant 12 : index
    %c0_93 = arith.constant 0 : index
    %351 = vector.load %arg3[%c12, %c0_93] : memref<28x32xf32, #tpu.memory_space<vmem>>, vector<4x32xf32>
    tpu.vector_store %arg3[%c12, %c0_93], %350 {strides = array<i32>} : memref<28x32xf32, #tpu.memory_space<vmem>>, vector<4x32xf32>,
    %352 = vector.extract_strided_slice %17 {offsets = [16, 0], sizes = [4, 96], strides = [1, 1]} : vector<28x96xf32> to vector<4x96xf32>
    %cst_94 = arith.constant dense<0.000000e+00> : vector<4x96xf32>
    %353 = tpu.matmul %350, %19, %cst_94 {dimension_numbers = #tpu.dot_dimension_numbers<[1], [0], [0], [1], [0, 0, 1, 1], [], []>} : vector<4x32xf32>, vector<32x96xf32>, vector<4x96xf32> -> vector<4x96xf32>
    %354 = vector.extract_strided_slice %352 {offsets = [0, 0], sizes = [4, 64], strides = [1, 1]} : vector<4x96xf32> to vector<4x64xf32>
    %355 = vector.extract_strided_slice %353 {offsets = [0, 0], sizes = [4, 64], strides = [1, 1]} : vector<4x96xf32> to vector<4x64xf32>
    %356 = arith.addf %354, %355 : vector<4x64xf32>
    %cst_95 = arith.constant 5.000000e-01 : f32
    %357 = vector.broadcast %cst_95 : f32 to vector<4x64xf32>
    %358 = arith.mulf %357, %356 : vector<4x64xf32>
    %359 = math.tanh %358 : vector<4x64xf32>
    %cst_96 = arith.constant 1.000000e+00 : f32
    %360 = vector.broadcast %cst_96 : f32 to vector<4x64xf32>
    %361 = arith.addf %360, %359 : vector<4x64xf32>
    %cst_97 = arith.constant 5.000000e-01 : f32
    %362 = vector.broadcast %cst_97 : f32 to vector<4x64xf32>
    %363 = arith.mulf %362, %361 : vector<4x64xf32>
    %364 = vector.extract_strided_slice %363 {offsets = [0, 0], sizes = [4, 32], strides = [1, 1]} : vector<4x64xf32> to vector<4x32xf32>
    %365 = vector.extract_strided_slice %363 {offsets = [0, 32], sizes = [4, 32], strides = [1, 1]} : vector<4x64xf32> to vector<4x32xf32>
    %366 = vector.extract_strided_slice %352 {offsets = [0, 64], sizes = [4, 32], strides = [1, 1]} : vector<4x96xf32> to vector<4x32xf32>
    %367 = vector.extract_strided_slice %353 {offsets = [0, 64], sizes = [4, 32], strides = [1, 1]} : vector<4x96xf32> to vector<4x32xf32>
    %368 = arith.addf %367, %25 : vector<4x32xf32>
    %369 = arith.mulf %364, %368 : vector<4x32xf32>
    %370 = arith.addf %366, %369 : vector<4x32xf32>
    %371 = math.tanh %370 : vector<4x32xf32>
    %cst_98 = arith.constant 1.000000e+00 : f32
    %372 = vector.broadcast %cst_98 : f32 to vector<4x32xf32>
    %373 = arith.subf %372, %365 : vector<4x32xf32>
    %374 = arith.mulf %373, %371 : vector<4x32xf32>
    %375 = arith.mulf %365, %350 : vector<4x32xf32>
    %376 = arith.addf %374, %375 : vector<4x32xf32>
    %c16_99 = arith.constant 16 : index
    %c0_100 = arith.constant 0 : index
    %377 = vector.load %arg3[%c16_99, %c0_100] : memref<28x32xf32, #tpu.memory_space<vmem>>, vector<4x32xf32>
    tpu.vector_store %arg3[%c16_99, %c0_100], %376 {strides = array<i32>} : memref<28x32xf32, #tpu.memory_space<vmem>>, vector<4x32xf32>,
    %378 = vector.extract_strided_slice %17 {offsets = [20, 0], sizes = [4, 96], strides = [1, 1]} : vector<28x96xf32> to vector<4x96xf32>
    %cst_101 = arith.constant dense<0.000000e+00> : vector<4x96xf32>
    %379 = tpu.matmul %376, %19, %cst_101 {dimension_numbers = #tpu.dot_dimension_numbers<[1], [0], [0], [1], [0, 0, 1, 1], [], []>} : vector<4x32xf32>, vector<32x96xf32>, vector<4x96xf32> -> vector<4x96xf32>
    %380 = vector.extract_strided_slice %378 {offsets = [0, 0], sizes = [4, 64], strides = [1, 1]} : vector<4x96xf32> to vector<4x64xf32>
    %381 = vector.extract_strided_slice %379 {offsets = [0, 0], sizes = [4, 64], strides = [1, 1]} : vector<4x96xf32> to vector<4x64xf32>
    %382 = arith.addf %380, %381 : vector<4x64xf32>
    %cst_102 = arith.constant 5.000000e-01 : f32
    %383 = vector.broadcast %cst_102 : f32 to vector<4x64xf32>
    %384 = arith.mulf %383, %382 : vector<4x64xf32>
    %385 = math.tanh %384 : vector<4x64xf32>
    %cst_103 = arith.constant 1.000000e+00 : f32
    %386 = vector.broadcast %cst_103 : f32 to vector<4x64xf32>
    %387 = arith.addf %386, %385 : vector<4x64xf32>
    %cst_104 = arith.constant 5.000000e-01 : f32
    %388 = vector.broadcast %cst_104 : f32 to vector<4x64xf32>
    %389 = arith.mulf %388, %387 : vector<4x64xf32>
    %390 = vector.extract_strided_slice %389 {offsets = [0, 0], sizes = [4, 32], strides = [1, 1]} : vector<4x64xf32> to vector<4x32xf32>
    %391 = vector.extract_strided_slice %389 {offsets = [0, 32], sizes = [4, 32], strides = [1, 1]} : vector<4x64xf32> to vector<4x32xf32>
    %392 = vector.extract_strided_slice %378 {offsets = [0, 64], sizes = [4, 32], strides = [1, 1]} : vector<4x96xf32> to vector<4x32xf32>
    %393 = vector.extract_strided_slice %379 {offsets = [0, 64], sizes = [4, 32], strides = [1, 1]} : vector<4x96xf32> to vector<4x32xf32>
    %394 = arith.addf %393, %25 : vector<4x32xf32>
    %395 = arith.mulf %390, %394 : vector<4x32xf32>
    %396 = arith.addf %392, %395 : vector<4x32xf32>
    %397 = math.tanh %396 : vector<4x32xf32>
    %cst_105 = arith.constant 1.000000e+00 : f32
    %398 = vector.broadcast %cst_105 : f32 to vector<4x32xf32>
    %399 = arith.subf %398, %391 : vector<4x32xf32>
    %400 = arith.mulf %399, %397 : vector<4x32xf32>
    %401 = arith.mulf %391, %376 : vector<4x32xf32>
    %402 = arith.addf %400, %401 : vector<4x32xf32>
    %c20 = arith.constant 20 : index
    %c0_106 = arith.constant 0 : index
    %403 = vector.load %arg3[%c20, %c0_106] : memref<28x32xf32, #tpu.memory_space<vmem>>, vector<4x32xf32>
    tpu.vector_store %arg3[%c20, %c0_106], %402 {strides = array<i32>} : memref<28x32xf32, #tpu.memory_space<vmem>>, vector<4x32xf32>,
    %404 = vector.extract_strided_slice %17 {offsets = [24, 0], sizes = [4, 96], strides = [1, 1]} : vector<28x96xf32> to vector<4x96xf32>
    %cst_107 = arith.constant dense<0.000000e+00> : vector<4x96xf32>
    %405 = tpu.matmul %402, %19, %cst_107 {dimension_numbers = #tpu.dot_dimension_numbers<[1], [0], [0], [1], [0, 0, 1, 1], [], []>} : vector<4x32xf32>, vector<32x96xf32>, vector<4x96xf32> -> vector<4x96xf32>
    %406 = vector.extract_strided_slice %404 {offsets = [0, 0], sizes = [4, 64], strides = [1, 1]} : vector<4x96xf32> to vector<4x64xf32>
    %407 = vector.extract_strided_slice %405 {offsets = [0, 0], sizes = [4, 64], strides = [1, 1]} : vector<4x96xf32> to vector<4x64xf32>
    %408 = arith.addf %406, %407 : vector<4x64xf32>
    %cst_108 = arith.constant 5.000000e-01 : f32
    %409 = vector.broadcast %cst_108 : f32 to vector<4x64xf32>
    %410 = arith.mulf %409, %408 : vector<4x64xf32>
    %411 = math.tanh %410 : vector<4x64xf32>
    %cst_109 = arith.constant 1.000000e+00 : f32
    %412 = vector.broadcast %cst_109 : f32 to vector<4x64xf32>
    %413 = arith.addf %412, %411 : vector<4x64xf32>
    %cst_110 = arith.constant 5.000000e-01 : f32
    %414 = vector.broadcast %cst_110 : f32 to vector<4x64xf32>
    %415 = arith.mulf %414, %413 : vector<4x64xf32>
    %416 = vector.extract_strided_slice %415 {offsets = [0, 0], sizes = [4, 32], strides = [1, 1]} : vector<4x64xf32> to vector<4x32xf32>
    %417 = vector.extract_strided_slice %415 {offsets = [0, 32], sizes = [4, 32], strides = [1, 1]} : vector<4x64xf32> to vector<4x32xf32>
    %418 = vector.extract_strided_slice %404 {offsets = [0, 64], sizes = [4, 32], strides = [1, 1]} : vector<4x96xf32> to vector<4x32xf32>
    %419 = vector.extract_strided_slice %405 {offsets = [0, 64], sizes = [4, 32], strides = [1, 1]} : vector<4x96xf32> to vector<4x32xf32>
    %420 = arith.addf %419, %25 : vector<4x32xf32>
    %421 = arith.mulf %416, %420 : vector<4x32xf32>
    %422 = arith.addf %418, %421 : vector<4x32xf32>
    %423 = math.tanh %422 : vector<4x32xf32>
    %cst_111 = arith.constant 1.000000e+00 : f32
    %424 = vector.broadcast %cst_111 : f32 to vector<4x32xf32>
    %425 = arith.subf %424, %417 : vector<4x32xf32>
    %426 = arith.mulf %425, %423 : vector<4x32xf32>
    %427 = arith.mulf %417, %402 : vector<4x32xf32>
    %428 = arith.addf %426, %427 : vector<4x32xf32>
    %c24_112 = arith.constant 24 : index
    %c0_113 = arith.constant 0 : index
    %429 = vector.load %arg3[%c24_112, %c0_113] : memref<28x32xf32, #tpu.memory_space<vmem>>, vector<4x32xf32>
    tpu.vector_store %arg3[%c24_112, %c0_113], %428 {strides = array<i32>} : memref<28x32xf32, #tpu.memory_space<vmem>>, vector<4x32xf32>,
    %c24_114 = arith.constant 24 : index
    %c224 = arith.constant 224 : index
    %430 = vector.load %arg1[%c24_114, %c224] : memref<89x256xf32, #tpu.memory_space<vmem>>, vector<32x32xf32>
    %c88_115 = arith.constant 88 : index
    %c32_116 = arith.constant 32 : index
    %431 = vector.load %arg1[%c88_115, %c32_116] : memref<89x256xf32, #tpu.memory_space<vmem>>, vector<1x32xf32>
    %c0_117 = arith.constant 0 : index
    %c0_118 = arith.constant 0 : index
    %432 = vector.load %arg3[%c0_117, %c0_118] : memref<28x32xf32, #tpu.memory_space<vmem>>, vector<28x32xf32>
    %cst_119 = arith.constant dense<0.000000e+00> : vector<28x32xf32>
    %433 = tpu.matmul %432, %430, %cst_119 {dimension_numbers = #tpu.dot_dimension_numbers<[1], [0], [0], [1], [0, 0, 1, 1], [], []>} : vector<28x32xf32>, vector<32x32xf32>, vector<28x32xf32> -> vector<28x32xf32>
    %434 = vector.broadcast %431 : vector<1x32xf32> to vector<28x32xf32>
    %435 = arith.addf %433, %434 : vector<28x32xf32>
    %c0_120 = arith.constant 0 : index
    %c0_121 = arith.constant 0 : index
    %436 = vector.load %arg2[%c0_120, %c0_121] : memref<32x128xf32, #tpu.memory_space<vmem>>, vector<28x32xf32>
    tpu.vector_store %arg2[%c0_120, %c0_121], %435 {strides = array<i32>} : memref<32x128xf32, #tpu.memory_space<vmem>>, vector<28x32xf32>,
    return
  }
}

</mosaic_0001>

<bundles_post_ra>
// kernel: dissonet_forward.1
= control target key start
LH: loop header
LB: loop body
LE: loop exit
PB: predicated region body
PF: predicated region fallthrough
CT: control target
= control target key end

     0   :  { %v16_v0 = vlaneseq  ;;  %v2718_v4 = vmov 0.0   ;;  %vm79_vm0 = vcmask 130048   ;;  %s2719_s4 = smov 64   ;;  %vm2720_vm4 = vmmov 0   ;;  %s2721_s11 = smov 96   ;;  %s3280_s1 = inlined_call_operand.vmem [shape: f32[89,256], index: 1, kind: input, shape index: {}]   ;;  %s3281_s0 = inlined_call_operand.vmem [shape: s32[1,32], index: 0, kind: input, shape index: {}]   ;;  %s3282_s2 = inlined_call_operand.vmem [shape: f32[32,128], index: 2, kind: output, shape index: {}]  }
   0x1   :  { %v76_v1 = vld [vmem:[%s3280_s1 + $0x18] sm:$0xff]  ;;  %v75_v2 = vld [vmem:[%s3280_s1 + $0x10] sm:$0xff]  ;;  %v74_v3 = vld [vmem:[%s3280_s1 + $0x8] sm:$0xff]  ;;  %168 = vmatprep.mubr.f32.mxu1 %v2718_v4  ;;  %156 = vmatprep.mubr.f32.mxu0 %v2718_v4  ;;  %vm192_vm6 = vcmask 261120   ;;  %s2722_s12 = smov 32   ;;  %14 = vst [vmem:[%s3282_s2 + $0x18] sm:$0xff] %v2718_v4 }
   0x2   :  { %2646 = vmatprep.subr.mxu1 %v76_v1  ;;  %120 = vmatprep.subr.mxu0 %v76_v1  ;;  %v73_v5 = vld [vmem:[%s3280_s1] sm:$0xff]  ;;  %v2753_v6 = vshrl.u32 %v16_v0, 7  ;;  %v2758_v7 = vld [vmem:[%s3280_s1 + $0x90] sm:$0xff]  ;;  %11 = vst [vmem:[%s3282_s2] sm:$0xff] %v2718_v4  ;;  %12 = vst [vmem:[%s3282_s2 + $0x8] sm:$0xff] %v2718_v4  ;;  %vm1405_vm7 = vcmask 392452   ;;  %vm1522_vm8 = vcmask 257024  }
   0x3   :  { %2648 = vmatpush1.msra.mxu1 %v75_v2  ;;  %121 = vmatpush1.msra.mxu0 %v75_v2  ;;  %v2763_v8 = vld [vmem:[%s3280_s1 + $0x70] sm:$0xff]  ;;  %v2301_v9 = vld [vmem:[%s3281_s0] ss:$0 sm:$0xff]  ;;  %v302_v14 = vld [vmem:[%s3280_s1 + $0x21] ss:$0 sm:$0xff]  ;;  %13 = vst [vmem:[%s3282_s2 + $0x10] sm:$0xff] %v2718_v4 }
   0x4   :  { %2647 = vmatprep.subr.mxu1 %v74_v3  ;;  %122 = vmatprep.subr.mxu0 %v74_v3  ;;  %vm25_vm1 = vcmp.eq.s32.totalorder %v2301_v9, %v2753_v6  ;;  %v18_v10 = vadd.s32 8, %v2753_v6  ;;  %v19_v12 = vadd.s32 16, %v2753_v6  ;;  %v2779_v13 = vld [vmem:[%s3280_s1 + $0x60] sm:$0xff]  ;;  %v2802_v18 = vld [vmem:[%s3280_s1 + $0x50] sm:$0xff]  ;;  %v20_v19 = vadd.s32 24, %v2753_v6 }
   0x5   :  { %2649 = vmatpush1.msra.mxu1 %v73_v5  ;;  %123 = vmatpush1.msra.mxu0 %v73_v5  ;;  %v2302_v11 = vsel %vm25_vm1, 1.0, %v2718_v4  ;;  %v2788_v15 = vld [vmem:[%s3280_s1 + $0xa0] sm:$0xff]  ;;  %v2824_v22 = vld [vmem:[%s3280_s1 + $0x30] sm:$0xff]  ;;  %v184_v37 = vsub.s32 0, %v2753_v6  ;;  %vm1631_vm9 = vcmask 261124   ;;  %vm1411_vm10 = vcmask 650624  }
   0x6   :  { %2309 = vmatmul.mubr.msk.f32.vlgmr.msra.gmra.mxu1 %vm79_vm0, %v2758_v7  ;;  %2307 = vmatmul.mubr.msk.f32.vlgmr.msra.gmra.mxu0 %vm79_vm0, %v2763_v8  ;;  %vm26_vm2 = vcmp.eq.s32.totalorder %v2301_v9, %v18_v10  ;;  %v2794_v16 = vld [vmem:[%s3280_s1 + $0x80] sm:$0xff]  ;;  %vm27_vm3 = vcmp.eq.s32.totalorder %v2301_v9, %v19_v12  ;;  %vm28_vm5 = vcmp.eq.s32.totalorder %v2301_v9, %v20_v19 }
   0x7   :  { %174 = vmatprep.mubr.f32.mxu1 %v2718_v4  ;;  %162 = vmatprep.mubr.f32.mxu0 %v2718_v4  ;;  %v2303_v17 = vsel %vm26_vm2, 1.0, %v2718_v4  ;;  %v2814_v20 = vld [vmem:[%s3280_s1 + $0x40] sm:$0xff]  ;;  %v2304_v21 = vsel %vm27_vm3, 1.0, %v2718_v4  ;;  %v2305_v23 = vsel %vm28_vm5, 1.0, %v2718_v4 }
   0x8   :  { %37 = vxpose.xlu0.b32.start [1/4] (short) (narrow) %v2302_v11, 32  ;;  %2434 = vmatprep.subr.mxu0 %v2718_v4  ;;  %v2862_v38 = vld [vmem:[%s3280_s1 + $0x20] ss:$8 sm:$0x3] }
   0x9   :  { %2435 = vmatpush3.msra.mxu0 %v2779_v13  ;;  %383 = vrot.lane.b32.xlu1 %v302_v14, %s2719_s4  ;;  %v2865_v39 = vrot.slane %v2862_v38, %v184_v37 }
   0xa   :  { %2310 = vmatmul.mubr.msk.f32.gmra.mxu1 %vm79_vm0, %v2788_v15  ;;  %2308 = vmatmul.mubr.msk.f32.gmra.mxu0 %vm79_vm0, %v2794_v16 }
   0xb   :  { %2436 = vmatprep.subr.mxu0 %v2718_v4  ;;  %2442 = vmatprep.mubr.msk.f32.mxu0 %vm2720_vm4, %v2718_v4 }
   0xc   :  { %38 = vxpose.xlu0.b32.cont [2/4] (short) (narrow) %v2303_v17, 32  ;;  %2437 = vmatpush3.msra.mxu0 %v2802_v18 }
   0xd   :  { %2438 = vmatprep.subr.mxu0 %v2718_v4  ;;  %269 = vmatprep.mubr.f32.mxu1 %v2718_v4 }
   0xe   :  { %2439 = vmatpush3.msra.mxu0 %v2814_v20 }
   0xf   :  { %2440 = vmatprep.subr.mxu0 %v2718_v4 }
  0x10   :  { %39 = vxpose.xlu0.b32.cont [3/4] (short) (narrow) %v2304_v21, 32  ;;  %2441 = vmatpush3.msra.mxu0 %v2824_v22 }
  0x11   :  { %2443 = vmatmul.mubr.f32.vlgmr.msra.gmra.mxu0 %v2718_v4  ;;  %2456 = vmatprep.subr.mxu0 %v2718_v4 }
  0x12   :  { %2457 = vmatpush3.msra.mxu0 %v2779_v13  ;;  %2464 = vmatprep.mubr.msk.f32.mxu0 %vm2720_vm4, %v2718_v4 }
  0x13   :  { %2458 = vmatprep.subr.mxu0 %v2718_v4 }
  0x14   :  { %40 = vxpose.xlu0.b32.end [4/4] (short) (narrow) %v2305_v23, 32  ;;  %2459 = vmatpush3.msra.mxu0 %v2802_v18 }
  0x15   :  { %2460 = vmatprep.subr.mxu0 %v2718_v4 }
  0x16   :  { %2461 = vmatpush3.msra.mxu0 %v2814_v20 }
  0x17   :  { %2462 = vmatprep.subr.mxu0 %v2718_v4 }
  0x18   :  { %2463 = vmatpush3.msra.mxu0 %v2824_v22 }
  0x19   :  { %2478 = vmatprep.subr.mxu0 %v2718_v4 }
  0x7b   :  { %v2843_v32 = vpop.permute.xlu1 %383 }
  0x84   :  { %v53_v34 = vpop.trf.xlu0 }
  0x88   :  { %v54_v51 = vpop.trf.xlu0 }
  0x8c   :  { %v55_v52 = vpop.trf.xlu0 }
  0x90   :  { %v56_v54 = vpop.trf.xlu0 }
  0xc6   :  { %v170_v24 = vpop.f32.mrf.mxu1  ;;  %v158_v25 = vpop.f32.mrf.mxu0 }
  0xc8   :  { %v172_v26 = vpop.f32.mrf.mxu1  ;;  %v160_v27 = vpop.f32.mrf.mxu0 }
  0xca   :  { %v176_v28 = vpop.f32.mrf.mxu1  ;;  %v164_v29 = vpop.f32.mrf.mxu0 }
  0xcc   :  { %v178_v30 = vpop.f32.mrf.mxu1  ;;  %v166_v31 = vpop.f32.mrf.mxu0 }
  0xcd   :  { %229 = vmatprep.subr.mxu1 %v178_v30 }
  0xce   :  { %230 = vmatpush1.msra.mxu1 %v176_v28 }
  0xcf   :  { %231 = vmatprep.subr.mxu1 %v172_v26 }
  0xd0   :  { %232 = vmatpush1.msra.mxu1 %v170_v24 }
  0xd1   :  { %233 = vmatprep.subr.mxu1 %v166_v31  ;;  %v373_v33 = vpop.f32.mrf.mxu0 }
  0xd2   :  { %234 = vmatpush1.msra.mxu1 %v164_v29  ;;  %v386_v35 = vadd.f32 %v2843_v32, %v373_v33 }
  0xd3   :  { %235 = vmatprep.subr.mxu1 %v160_v27  ;;  %v2444_v36 = vpop.f32.mrf.mxu0 }
  0xd4   :  { %236 = vmatpush1.msra.mxu1 %v158_v25  ;;  %388 = vrot.lane.b32.xlu1 %v386_v35, %s2719_s4 }
  0xd5   :  { %2311 = vmatmul.mubr.msk.f32.vlgmr.msra.gmra.mxu1 %vm192_vm6, %v53_v34  ;;  %2445 = vmatprep.subr.mxu1 %v2718_v4 }
  0xd6   :  { %2446 = vmatpush3.msra.mxu1 %v2779_v13  ;;  %275 = vmatprep.mubr.f32.mxu1 %v2718_v4 }
  0xd7   :  { %2447 = vmatprep.subr.mxu1 %v2718_v4 }
  0xd8   :  { %2448 = vmatpush3.msra.mxu1 %v2802_v18 }
  0xd9   :  { %2449 = vmatprep.subr.mxu1 %v2718_v4  ;;  %2312 = vmatmul.mubr.msk.f32.gmra.mxu1 %vm192_vm6, %v54_v51 }
  0xda   :  { %2450 = vmatpush3.msra.mxu1 %v2814_v20  ;;  %281 = vmatprep.mubr.f32.mxu1 %v2718_v4 }
  0xdb   :  { %2451 = vmatprep.subr.mxu1 %v2718_v4 }
  0xdc   :  { %2452 = vmatpush3.msra.mxu1 %v2824_v22 }
  0xdd   :  { %2467 = vmatprep.subr.mxu1 %v2718_v4  ;;  %2313 = vmatmul.mubr.msk.f32.gmra.mxu1 %vm192_vm6, %v55_v52 }
  0xde   :  { %287 = vmatprep.mubr.f32.mxu1 %v2718_v4 }
  0xe1   :  { %2314 = vmatmul.mubr.msk.f32.gmra.mxu1 %vm192_vm6, %v56_v54 }
  0xe2   :  { %2453 = vmatprep.mubr.msk.f32.mxu1 %vm2720_vm4, %v2718_v4 }
 0x146   :  { %v389_v46 = vpop.permute.xlu1 %388 }
 0x195   :  { %v271_v40 = vpop.f32.mrf.mxu1 }
 0x196   :  { %v2868_v41 = vadd.f32 %v271_v40, %v2865_v39 }
 0x197   :  { %v2893_v61 = vpop.f32.mrf.mxu1 }
 0x198   :  { %v377_v42 = vadd.f32 %v373_v33, %v2868_v41 }
 0x199   :  { %v277_v62 = vpop.f32.mrf.mxu1 }
 0x19a   :  { %v378_v43 = vmul.f32 0.5, %v377_v42 }
 0x19b   :  { %v2895_v63 = vpop.f32.mrf.mxu1 }
 0x19c   :  { %2656 = vtanh.f32 %v378_v43  ;;  %v278_v43 = vadd.f32 %v277_v62, %v2865_v39 }
 0x19d   :  { %v2897_v0 = vpop.f32.mrf.mxu1 }
 0x19f   :  { %v2899_v1 = vpop.f32.mrf.mxu1 }
 0x1a1   :  { %v2901_v2 = vpop.f32.mrf.mxu1 }
 0x1a3   :  { %v2903_v3 = vpop.f32.mrf.mxu1 }
 0x1a9   :  { %v2657_v44 = vpop.eup %2656 }
 0x1aa   :  { %v380_v45 = vadd.f32 1.0, %v2657_v44 }
 0x1ac   :  { %v381_v47 = vmul.f32 0.5, %v380_v45 }
 0x1ae   :  { %v391_v48 = vmul.f32 %v389_v46, %v381_v47  ;;  %v398_v55 = vsub.f32 1.0, %v381_v47  ;;  %v404_v57 = vmul.f32 0.0, %v381_v47 }
 0x1b0   :  { %393 = vrot.lane.b32.xlu1 %v391_v48, %s2719_s4 }
 0x222   :  { %v394_v49 = vpop.permute.xlu1 %393 }
 0x223   :  { %v396_v50 = vadd.f32 %v394_v49, %v2868_v41 }
 0x225   :  { %2658 = vtanh.f32 %v396_v50 }
 0x232   :  { %v2659_v53 = vpop.eup %2658 }
 0x233   :  { %400 = vrot.lane.b32.xlu1 %v2659_v53, %s2721_s11 }
 0x2a5   :  { %v401_v56 = vpop.permute.xlu1 %400 }
 0x2a6   :  { %v403_v58 = vmul.f32 %v401_v56, %v398_v55 }
 0x2a8   :  { %v405_v59 = vadd.f32 %v404_v57, %v403_v58 }
 0x2aa   :  { %407 = vrot.lane.b32.xlu0 %v405_v59, %s2721_s11  ;;  %v508_v29 = vrot.slane %v405_v59, 4 }
 0x31c   :  { %v408_v60 = vpop.permute.xlu0 %407 }
 0x31d   :  { %2454 = vmatmul.mubr.msk.f32.vlgmr.msra.gmra.mxu1 %vm192_vm6, %v408_v60 }
 0x31e   :  { %2468 = vmatpush3.msra.mxu1 %v2779_v13  ;;  %2475 = vmatprep.mubr.msk.f32.mxu1 %vm2720_vm4, %v2718_v4 }
 0x31f   :  { %2469 = vmatprep.subr.mxu1 %v2718_v4 }
 0x320   :  { %2470 = vmatpush3.msra.mxu1 %v2802_v18 }
 0x321   :  { %2471 = vmatprep.subr.mxu1 %v2718_v4 }
 0x322   :  { %2472 = vmatpush3.msra.mxu1 %v2814_v20 }
 0x323   :  { %2473 = vmatprep.subr.mxu1 %v2718_v4 }
 0x324   :  { %2474 = vmatpush3.msra.mxu1 %v2824_v22 }
 0x325   :  { %2489 = vmatprep.subr.mxu1 %v2718_v4 }
 0x3dd   :  { %v477_v5 = vpop.f32.mrf.mxu1 }
 0x3de   :  { %v489_v9 = vadd.f32 %v477_v5, %v2843_v32  ;;  %v482_v12 = vrot.slane %v477_v5, 4 }
 0x3df   :  { %v2455_v10 = vpop.f32.mrf.mxu1 }
 0x3e0   :  { %v491_v11 = vrot.slane %v489_v9, 4  ;;  %v484_v14 = vadd.f32 %v482_v12, %v2868_v41 }
 0x3e2   :  { %492 = vrot.lane.b32.xlu1 %v491_v11, %s2719_s4  ;;  %v485_v17 = vmul.f32 0.5, %v484_v14 }
 0x3e4   :  { %2660 = vtanh.f32 %v485_v17 }
 0x3f1   :  { %v2661_v19 = vpop.eup %2660 }
 0x3f2   :  { %v487_v21 = vadd.f32 1.0, %v2661_v19 }
 0x3f4   :  { %v488_v23 = vmul.f32 0.5, %v487_v21 }
 0x3f6   :  { %v502_v30 = vsub.f32 1.0, %v488_v23  ;;  %v510_v33 = vmul.f32 %v508_v29, %v488_v23 }
 0x454   :  { %v493_v24 = vpop.permute.xlu1 %492 }
 0x455   :  { %v495_v25 = vmul.f32 %v493_v24, %v488_v23 }
 0x457   :  { %497 = vrot.lane.b32.xlu1 %v495_v25, %s2719_s4 }
 0x4c9   :  { %v498_v26 = vpop.permute.xlu1 %497 }
 0x4ca   :  { %v500_v27 = vadd.f32 %v498_v26, %v2868_v41 }
 0x4cc   :  { %2662 = vtanh.f32 %v500_v27 }
 0x4d9   :  { %v2663_v28 = vpop.eup %2662 }
 0x4da   :  { %504 = vrot.lane.b32.xlu1 %v2663_v28, %s2721_s11 }
 0x54c   :  { %v505_v31 = vpop.permute.xlu1 %504 }
 0x54d   :  { %v507_v34 = vmul.f32 %v505_v31, %v502_v30 }
 0x54f   :  { %v511_v35 = vadd.f32 %v510_v33, %v507_v34 }
 0x551   :  { %v513_v36 = vrot.slane %v511_v35, 4 }
 0x553   :  { %514 = vrot.lane.b32.xlu1 %v513_v36, %s2721_s11 }
 0x5c5   :  { %v515_v37 = vpop.permute.xlu1 %514 }
 0x5c6   :  { %2465 = vmatmul.mubr.msk.f32.vlgmr.msra.gmra.mxu0 %vm192_vm6, %v515_v37 }
 0x5c7   :  { %2479 = vmatpush3.msra.mxu0 %v2779_v13  ;;  %2486 = vmatprep.mubr.msk.f32.mxu0 %vm2720_vm4, %v2718_v4 }
 0x5c8   :  { %2480 = vmatprep.subr.mxu0 %v2718_v4 }
 0x5c9   :  { %2481 = vmatpush3.msra.mxu0 %v2802_v18 }
 0x5ca   :  { %2482 = vmatprep.subr.mxu0 %v2718_v4 }
 0x5cb   :  { %2483 = vmatpush3.msra.mxu0 %v2814_v20 }
 0x5cc   :  { %2484 = vmatprep.subr.mxu0 %v2718_v4 }
 0x5cd   :  { %2485 = vmatpush3.msra.mxu0 %v2824_v22 }
 0x5ce   :  { %2500 = vmatprep.subr.mxu0 %v2718_v4 }
 0x686   :  { %v584_v40 = vpop.f32.mrf.mxu0 }
 0x687   :  { %v593_v41 = vadd.f32 %v584_v40, %v2843_v32  ;;  %v588_v44 = vadd.f32 %v584_v40, %v278_v43 }
 0x688   :  { %v2466_v42 = vpop.f32.mrf.mxu0 }
 0x689   :  { %595 = vrot.lane.b32.xlu1 %v593_v41, %s2719_s4  ;;  %v589_v45 = vmul.f32 0.5, %v588_v44  ;;  %v284_v41 = vadd.f32 %v2897_v0, %v2865_v39 }
 0x68b   :  { %2664 = vtanh.f32 %v589_v45 }
 0x698   :  { %v2665_v46 = vpop.eup %2664 }
 0x699   :  { %v591_v47 = vadd.f32 1.0, %v2665_v46 }
 0x69b   :  { %v592_v48 = vmul.f32 0.5, %v591_v47 }
 0x69d   :  { %v605_v54 = vsub.f32 1.0, %v592_v48  ;;  %v612_v56 = vmul.f32 %v592_v48, %v513_v36 }
 0x6fb   :  { %v596_v49 = vpop.permute.xlu1 %595 }
 0x6fc   :  { %v598_v50 = vmul.f32 %v596_v49, %v592_v48 }
 0x6fe   :  { %600 = vrot.lane.b32.xlu1 %v598_v50, %s2719_s4 }
 0x770   :  { %v601_v51 = vpop.permute.xlu1 %600 }
 0x771   :  { %v603_v52 = vadd.f32 %v601_v51, %v278_v43 }
 0x773   :  { %2666 = vtanh.f32 %v603_v52 }
 0x780   :  { %v2667_v53 = vpop.eup %2666 }
 0x781   :  { %607 = vrot.lane.b32.xlu1 %v2667_v53, %s2721_s11 }
 0x7f3   :  { %v608_v55 = vpop.permute.xlu1 %607 }
 0x7f4   :  { %v610_v57 = vmul.f32 %v608_v55, %v605_v54 }
 0x7f6   :  { %v613_v58 = vadd.f32 %v612_v56, %v610_v57 }
 0x7f8   :  { %615 = vrot.lane.b32.xlu1 %v613_v58, %s2721_s11  ;;  %v716_v27 = vrot.slane %v613_v58, 4 }
 0x86a   :  { %v616_v59 = vpop.permute.xlu1 %615 }
 0x86b   :  { %2476 = vmatmul.mubr.msk.f32.vlgmr.msra.gmra.mxu1 %vm192_vm6, %v616_v59 }
 0x86c   :  { %2490 = vmatpush3.msra.mxu1 %v2779_v13  ;;  %2497 = vmatprep.mubr.msk.f32.mxu1 %vm2720_vm4, %v2718_v4 }
 0x86d   :  { %2491 = vmatprep.subr.mxu1 %v2718_v4 }
 0x86e   :  { %2492 = vmatpush3.msra.mxu1 %v2802_v18 }
 0x86f   :  { %2493 = vmatprep.subr.mxu1 %v2718_v4 }
 0x870   :  { %2494 = vmatpush3.msra.mxu1 %v2814_v20 }
 0x871   :  { %2495 = vmatprep.subr.mxu1 %v2718_v4 }
 0x872   :  { %2496 = vmatpush3.msra.mxu1 %v2824_v22 }
 0x873   :  { %2511 = vmatprep.subr.mxu1 %v2718_v4 }
 0x92b   :  { %v685_v60 = vpop.f32.mrf.mxu1 }
 0x92c   :  { %v697_v62 = vadd.f32 %v685_v60, %v2843_v32  ;;  %v690_v10 = vrot.slane %v685_v60, 4 }
 0x92d   :  { %v2477_v5 = vpop.f32.mrf.mxu1 }
 0x92e   :  { %v699_v9 = vrot.slane %v697_v62, 4  ;;  %v692_v11 = vadd.f32 %v690_v10, %v278_v43 }
 0x930   :  { %700 = vrot.lane.b32.xlu1 %v699_v9, %s2719_s4  ;;  %v693_v12 = vmul.f32 0.5, %v692_v11 }
 0x932   :  { %2668 = vtanh.f32 %v693_v12 }
 0x93f   :  { %v2669_v14 = vpop.eup %2668 }
 0x940   :  { %v695_v17 = vadd.f32 1.0, %v2669_v14 }
 0x942   :  { %v696_v19 = vmul.f32 0.5, %v695_v17 }
 0x944   :  { %v710_v28 = vsub.f32 1.0, %v696_v19  ;;  %v718_v30 = vmul.f32 %v716_v27, %v696_v19 }
 0x9a2   :  { %v701_v21 = vpop.permute.xlu1 %700 }
 0x9a3   :  { %v703_v23 = vmul.f32 %v701_v21, %v696_v19 }
 0x9a5   :  { %705 = vrot.lane.b32.xlu1 %v703_v23, %s2719_s4 }
 0xa17   :  { %v706_v24 = vpop.permute.xlu1 %705 }
 0xa18   :  { %v708_v25 = vadd.f32 %v706_v24, %v278_v43 }
 0xa1a   :  { %2670 = vtanh.f32 %v708_v25 }
 0xa27   :  { %v2671_v26 = vpop.eup %2670 }
 0xa28   :  { %712 = vrot.lane.b32.xlu1 %v2671_v26, %s2721_s11 }
 0xa9a   :  { %v713_v29 = vpop.permute.xlu1 %712 }
 0xa9b   :  { %v715_v31 = vmul.f32 %v713_v29, %v710_v28 }
 0xa9d   :  { %v719_v33 = vadd.f32 %v718_v30, %v715_v31 }
 0xa9f   :  { %v721_v34 = vrot.slane %v719_v33, 4 }
 0xaa1   :  { %722 = vrot.lane.b32.xlu0 %v721_v34, %s2721_s11 }
 0xb13   :  { %v723_v35 = vpop.permute.xlu0 %722 }
 0xb14   :  { %2487 = vmatmul.mubr.msk.f32.vlgmr.msra.gmra.mxu0 %vm192_vm6, %v723_v35 }
 0xb15   :  { %2501 = vmatpush3.msra.mxu0 %v2779_v13  ;;  %2508 = vmatprep.mubr.msk.f32.mxu0 %vm2720_vm4, %v2718_v4 }
 0xb16   :  { %2502 = vmatprep.subr.mxu0 %v2718_v4 }
 0xb17   :  { %2503 = vmatpush3.msra.mxu0 %v2802_v18 }
 0xb18   :  { %2504 = vmatprep.subr.mxu0 %v2718_v4 }
 0xb19   :  { %2505 = vmatpush3.msra.mxu0 %v2814_v20 }
 0xb1a   :  { %2506 = vmatprep.subr.mxu0 %v2718_v4 }
 0xb1b   :  { %2507 = vmatpush3.msra.mxu0 %v2824_v22 }
 0xb1c   :  { %2522 = vmatprep.subr.mxu0 %v2718_v4 }
 0xbd4   :  { %v792_v36 = vpop.f32.mrf.mxu0 }
 0xbd5   :  { %v801_v37 = vadd.f32 %v792_v36, %v2843_v32  ;;  %v796_v42 = vadd.f32 %v792_v36, %v284_v41  ;;  %v290_v36 = vadd.f32 %v2901_v2, %v2865_v39 }
 0xbd6   :  { %v2488_v40 = vpop.f32.mrf.mxu0 }
 0xbd7   :  { %803 = vrot.lane.b32.xlu1 %v801_v37, %s2719_s4  ;;  %v797_v43 = vmul.f32 0.5, %v796_v42 }
 0xbd9   :  { %2672 = vtanh.f32 %v797_v43 }
 0xbe6   :  { %v2673_v44 = vpop.eup %2672 }
 0xbe7   :  { %v799_v45 = vadd.f32 1.0, %v2673_v44 }
 0xbe9   :  { %v800_v46 = vmul.f32 0.5, %v799_v45 }
 0xbeb   :  { %v813_v52 = vsub.f32 1.0, %v800_v46  ;;  %v820_v54 = vmul.f32 %v800_v46, %v721_v34 }
 0xc49   :  { %v804_v47 = vpop.permute.xlu1 %803 }
 0xc4a   :  { %v806_v48 = vmul.f32 %v804_v47, %v800_v46 }
 0xc4c   :  { %808 = vrot.lane.b32.xlu0 %v806_v48, %s2719_s4 }
 0xcbe   :  { %v809_v49 = vpop.permute.xlu0 %808 }
 0xcbf   :  { %v811_v50 = vadd.f32 %v809_v49, %v284_v41 }
 0xcc1   :  { %2674 = vtanh.f32 %v811_v50 }
 0xcce   :  { %v2675_v51 = vpop.eup %2674 }
 0xccf   :  { %815 = vrot.lane.b32.xlu1 %v2675_v51, %s2721_s11 }
 0xd41   :  { %v816_v53 = vpop.permute.xlu1 %815 }
 0xd42   :  { %v818_v0 = vmul.f32 %v816_v53, %v813_v52 }
 0xd44   :  { %v821_v55 = vadd.f32 %v820_v54, %v818_v0 }
 0xd46   :  { %823 = vrot.lane.b32.xlu0 %v821_v55, %s2721_s11  ;;  %v924_v24 = vrot.slane %v821_v55, 4 }
 0xdb8   :  { %v824_v56 = vpop.permute.xlu0 %823 }
 0xdb9   :  { %2498 = vmatmul.mubr.msk.f32.vlgmr.msra.gmra.mxu1 %vm192_vm6, %v824_v56 }
 0xdba   :  { %2512 = vmatpush3.msra.mxu1 %v2779_v13  ;;  %2519 = vmatprep.mubr.msk.f32.mxu1 %vm2720_vm4, %v2718_v4 }
 0xdbb   :  { %2513 = vmatprep.subr.mxu1 %v2718_v4 }
 0xdbc   :  { %2514 = vmatpush3.msra.mxu1 %v2802_v18 }
 0xdbd   :  { %2515 = vmatprep.subr.mxu1 %v2718_v4 }
 0xdbe   :  { %2516 = vmatpush3.msra.mxu1 %v2814_v20 }
 0xdbf   :  { %2517 = vmatprep.subr.mxu1 %v2718_v4 }
 0xdc0   :  { %2518 = vmatpush3.msra.mxu1 %v2824_v22 }
 0xdc1   :  { %2533 = vmatprep.subr.mxu1 %v2718_v4 }
 0xe79   :  { %v893_v57 = vpop.f32.mrf.mxu1 }
 0xe7a   :  { %v905_v58 = vadd.f32 %v893_v57, %v2843_v32  ;;  %v898_v62 = vrot.slane %v893_v57, 4 }
 0xe7b   :  { %v2499_v59 = vpop.f32.mrf.mxu1 }
 0xe7c   :  { %v907_v60 = vrot.slane %v905_v58, 4  ;;  %v900_v5 = vadd.f32 %v898_v62, %v284_v41 }
 0xe7e   :  { %908 = vrot.lane.b32.xlu1 %v907_v60, %s2719_s4  ;;  %v901_v9 = vmul.f32 0.5, %v900_v5 }
 0xe80   :  { %2676 = vtanh.f32 %v901_v9 }
 0xe8d   :  { %v2677_v10 = vpop.eup %2676 }
 0xe8e   :  { %v903_v11 = vadd.f32 1.0, %v2677_v10 }
 0xe90   :  { %v904_v12 = vmul.f32 0.5, %v903_v11 }
 0xe92   :  { %v918_v25 = vsub.f32 1.0, %v904_v12  ;;  %v926_v27 = vmul.f32 %v924_v24, %v904_v12 }
 0xef0   :  { %v909_v14 = vpop.permute.xlu1 %908 }
 0xef1   :  { %v911_v17 = vmul.f32 %v909_v14, %v904_v12 }
 0xef3   :  { %913 = vrot.lane.b32.xlu0 %v911_v17, %s2719_s4 }
 0xf65   :  { %v914_v19 = vpop.permute.xlu0 %913 }
 0xf66   :  { %v916_v21 = vadd.f32 %v914_v19, %v284_v41 }
 0xf68   :  { %2678 = vtanh.f32 %v916_v21 }
 0xf75   :  { %v2679_v23 = vpop.eup %2678 }
 0xf76   :  { %920 = vrot.lane.b32.xlu1 %v2679_v23, %s2721_s11 }
 0xfe8   :  { %v921_v26 = vpop.permute.xlu1 %920 }
 0xfe9   :  { %v923_v28 = vmul.f32 %v921_v26, %v918_v25 }
 0xfeb   :  { %v927_v29 = vadd.f32 %v926_v27, %v923_v28 }
 0xfed   :  { %v929_v30 = vrot.slane %v927_v29, 4 }
 0xfef   :  { %930 = vrot.lane.b32.xlu0 %v929_v30, %s2721_s11 }
0x1061   :  { %v931_v31 = vpop.permute.xlu0 %930 }
0x1062   :  { %2509 = vmatmul.mubr.msk.f32.vlgmr.msra.gmra.mxu0 %vm192_vm6, %v931_v31  ;;  %v3056_v31 = vld [vmem:[%s3280_s1 + $0x58] sm:$0xff] }
0x1063   :  { %2530 = vmatprep.mubr.msk.f32.mxu0 %vm2720_vm4, %v2718_v4 }
0x1122   :  { %v1000_v33 = vpop.f32.mrf.mxu0 }
0x1123   :  { %v1009_v34 = vadd.f32 %v1000_v33, %v2843_v32  ;;  %v1004_v37 = vadd.f32 %v1000_v33, %v290_v36  ;;  %v3061_v33 = vld [vmem:[%s3280_s1 + $0x48] sm:$0xff] }
0x1124   :  { %v2510_v35 = vpop.f32.mrf.mxu0 }
0x1125   :  { %1011 = vrot.lane.b32.xlu1 %v1009_v34, %s2719_s4  ;;  %v1005_v40 = vmul.f32 0.5, %v1004_v37  ;;  %v3068_v34 = vld [vmem:[%s3280_s1 + $0x38] sm:$0xff]  ;;  %v303_v35 = vld [vmem:[%s3280_s1 + $0x29] ss:$0 sm:$0xff] }
0x1127   :  { %2680 = vtanh.f32 %v1005_v40 }
0x1134   :  { %v2681_v41 = vpop.eup %2680 }
0x1135   :  { %v1007_v42 = vadd.f32 1.0, %v2681_v41 }
0x1137   :  { %v1008_v43 = vmul.f32 0.5, %v1007_v42 }
0x1139   :  { %v1021_v49 = vsub.f32 1.0, %v1008_v43  ;;  %v1028_v51 = vmul.f32 %v1008_v43, %v929_v30  ;;  %v3049_v30 = vld [vmem:[%s3280_s1 + $0x68] sm:$0xff] }
0x1197   :  { %v1012_v44 = vpop.permute.xlu1 %1011 }
0x1198   :  { %v1014_v45 = vmul.f32 %v1012_v44, %v1008_v43 }
0x119a   :  { %1016 = vrot.lane.b32.xlu0 %v1014_v45, %s2719_s4 }
0x120c   :  { %v1017_v46 = vpop.permute.xlu0 %1016 }
0x120d   :  { %v1019_v47 = vadd.f32 %v1017_v46, %v290_v36 }
0x120f   :  { %2682 = vtanh.f32 %v1019_v47 }
0x121c   :  { %v2683_v48 = vpop.eup %2682 }
0x121d   :  { %1023 = vrot.lane.b32.xlu1 %v2683_v48, %s2721_s11 }
0x128f   :  { %v1024_v50 = vpop.permute.xlu1 %1023 }
0x1290   :  { %v1026_v39 = vmul.f32 %v1024_v50, %v1021_v49  ;;  %v188_v49 = vsub.s32 1, %v2753_v6 }
0x1292   :  { %v1029_v2 = vadd.f32 %v1028_v51, %v1026_v39  ;;  %v3101_v50 = vrot.slane %v2862_v38, %v188_v49 }
0x1294   :  { %1031 = vrot.lane.b32.xlu0 %v1029_v2, %s2721_s11  ;;  %v1132_v11 = vrot.slane %v1029_v2, 4  ;;  %v3105_v51 = vadd.f32 %v2893_v61, %v3101_v50 }
0x1306   :  { %v1032_v52 = vpop.permute.xlu0 %1031 }
0x1307   :  { %2520 = vmatmul.mubr.msk.f32.vlgmr.msra.gmra.mxu1 %vm192_vm6, %v1032_v52 }
0x1308   :  { %2541 = vmatprep.mubr.msk.f32.mxu1 %vm2720_vm4, %v2718_v4 }
0x13c7   :  { %v1101_v53 = vpop.f32.mrf.mxu1 }
0x13c8   :  { %v1113_v54 = vadd.f32 %v1101_v53, %v2843_v32  ;;  %v1106_v56 = vrot.slane %v1101_v53, 4 }
0x13c9   :  { %v2521_v0 = vpop.f32.mrf.mxu1 }
0x13ca   :  { %v1115_v55 = vrot.slane %v1113_v54, 4  ;;  %v1108_v57 = vadd.f32 %v1106_v56, %v290_v36 }
0x13cc   :  { %1116 = vrot.lane.b32.xlu1 %v1115_v55, %s2719_s4  ;;  %v1109_v58 = vmul.f32 0.5, %v1108_v57 }
0x13ce   :  { %2684 = vtanh.f32 %v1109_v58 }
0x13db   :  { %v2685_v59 = vpop.eup %2684 }
0x13dc   :  { %v1111_v60 = vadd.f32 1.0, %v2685_v59 }
0x13de   :  { %v1112_v62 = vmul.f32 0.5, %v1111_v60 }
0x13e0   :  { %v1126_v12 = vsub.f32 1.0, %v1112_v62  ;;  %v1134_v17 = vmul.f32 %v1132_v11, %v1112_v62 }
0x143e   :  { %v1117_v5 = vpop.permute.xlu1 %1116 }
0x143f   :  { %v1119_v9 = vmul.f32 %v1117_v5, %v1112_v62 }
0x1441   :  { %1121 = vrot.lane.b32.xlu0 %v1119_v9, %s2719_s4 }
0x1445   :  { %1151 = vrot.lane.b32.xlu0 %v2779_v13, %s2722_s12 }
0x1449   :  { %1147 = vrot.lane.b32.xlu0 %v2814_v20, %s2722_s12 }
0x14b3   :  { %v1122_v32 = vpop.permute.xlu0 %1121 }
0x14b4   :  { %v1124_v10 = vadd.f32 %v1122_v32, %v290_v36  ;;  %v3081_v36 = vld [vmem:[%s3280_s1 + $0xb0] ss:$0 sm:$0xff]  ;;  %s2723_s1 = smov 48  }
0x14b6   :  { %2686 = vtanh.f32 %v1124_v10 }
0x14b7   :  { %v1152_v20 = vpop.permute.xlu0 %1151 }
0x14b8   :  { %2523 = vmatpush3.msra.mxu0 %v1152_v20 }
0x14b9   :  { %2524 = vmatprep.subr.mxu0 %v2718_v4 }
0x14bb   :  { %v1148_v24 = vpop.permute.xlu0 %1147 }
0x14c3   :  { %v2687_v13 = vpop.eup %2686 }
0x14c4   :  { %1128 = vrot.lane.b32.xlu1 %v2687_v13, %s2721_s11 }
0x14c8   :  { %1149 = vrot.lane.b32.xlu1 %v2802_v18, %s2722_s12 }
0x14cc   :  { %1145 = vrot.lane.b32.xlu1 %v2824_v22, %s2722_s12 }
0x14d0   :  { %1236 = vrot.lane.b32.xlu1 %v2788_v15, %s2721_s11 }
0x14d4   :  { %1232 = vrot.lane.b32.xlu1 %v2794_v16, %s2721_s11 }
0x14d8   :  { %1492 = vrot.lane.b32.xlu1 %v303_v35, %s2719_s4 }
0x1536   :  { %v1129_v14 = vpop.permute.xlu1 %1128 }
0x1537   :  { %v1131_v19 = vmul.f32 %v1129_v14, %v1126_v12 }
0x1539   :  { %v1135_v21 = vadd.f32 %v1134_v17, %v1131_v19 }
0x153a   :  { %v1150_v23 = vpop.permute.xlu1 %1149 }
0x153b   :  { %v1138_v25 = vrot.slane %v1135_v21, 4  ;;  %2525 = vmatpush3.msra.mxu0 %v1150_v23  ;;  %1406 = vst.msk [vmem:[%s3282_s2 + $0x18] sm:$0xf0] %vm1405_vm7, %v1135_v21 }
0x153c   :  { %2526 = vmatprep.subr.mxu0 %v2718_v4 }
0x153d   :  { %1139 = vrot.lane.b32.xlu0 %v1138_v25, %s2721_s11  ;;  %2527 = vmatpush3.msra.mxu0 %v1148_v24 }
0x153e   :  { %v1146_v18 = vpop.permute.xlu1 %1145  ;;  %2528 = vmatprep.subr.mxu0 %v2718_v4 }
0x153f   :  { %2529 = vmatpush3.msra.mxu0 %v1146_v18 }
0x1540   :  { %2544 = vmatprep.subr.mxu0 %v2718_v4 }
0x1541   :  { %1234 = vrot.lane.b32.xlu0 %v2758_v7, %s2721_s11 }
0x1542   :  { %v1237_v22 = vpop.permute.xlu1 %1236 }
0x1543   :  { %2534 = vmatpush3.msra.mxu1 %v1237_v22 }
0x1544   :  { %2535 = vmatprep.subr.mxu1 %v2718_v4 }
0x1545   :  { %1230 = vrot.lane.b32.xlu0 %v2763_v8, %s2721_s11 }
0x1546   :  { %v1233_v28 = vpop.permute.xlu1 %1232 }
0x154a   :  { %v3095_v45 = vpop.permute.xlu1 %1492 }
0x15af   :  { %v1140_v26 = vpop.permute.xlu0 %1139 }
0x15b0   :  { %2531 = vmatmul.mubr.msk.f32.vlgmr.msra.gmra.mxu0 %vm192_vm6, %v1140_v26 }
0x15b1   :  { %2552 = vmatprep.mubr.msk.f32.mxu0 %vm2720_vm4, %v2718_v4 }
0x15b3   :  { %v1235_v27 = vpop.permute.xlu0 %1234 }
0x15b4   :  { %2536 = vmatpush3.msra.mxu1 %v1235_v27 }
0x15b5   :  { %2537 = vmatprep.subr.mxu1 %v2718_v4 }
0x15b6   :  { %2538 = vmatpush3.msra.mxu1 %v1233_v28 }
0x15b7   :  { %2539 = vmatprep.subr.mxu1 %v2718_v4  ;;  %v1231_v29 = vpop.permute.xlu0 %1230 }
0x15b8   :  { %2540 = vmatpush3.msra.mxu1 %v1231_v29 }
0x15b9   :  { %2542 = vmatmul.mubr.msk.f32.vlgmr.msra.gmra.mxu1 %vm192_vm6, %v1140_v26  ;;  %2555 = vmatprep.subr.mxu1 %v2718_v4 }
0x15ba   :  { %2563 = vmatprep.mubr.msk.f32.mxu1 %vm2720_vm4, %v2718_v4  ;;  %2556 = vmatpush3.msra.mxu1 %v3049_v30 }
0x15bb   :  { %2557 = vmatprep.subr.mxu1 %v2718_v4 }
0x15bc   :  { %2558 = vmatpush3.msra.mxu1 %v3056_v31 }
0x15bd   :  { %2559 = vmatprep.subr.mxu1 %v2718_v4 }
0x15be   :  { %2560 = vmatpush3.msra.mxu1 %v3061_v33 }
0x15bf   :  { %2561 = vmatprep.subr.mxu1 %v2718_v4 }
0x15c0   :  { %2562 = vmatpush3.msra.mxu1 %v3068_v34 }
0x15c1   :  { %2577 = vmatprep.subr.mxu1 %v2718_v4 }
0x1670   :  { %v1225_v37 = vpop.f32.mrf.mxu0 }
0x1671   :  { %v1226_v40 = vadd.f32 %v1225_v37, %v3081_v36 }
0x1672   :  { %v2532_v41 = vpop.f32.mrf.mxu0 }
0x1673   :  { %2688 = vtanh.f32 %v1226_v40 }
0x1679   :  { %v1312_v42 = vpop.f32.mrf.mxu1 }
0x167b   :  { %v2543_v43 = vpop.f32.mrf.mxu1 }
0x1680   :  { %v2689_v44 = vpop.eup %2688 }
0x1681   :  { %2564 = vmatmul.mubr.msk.f32.vlgmr.msra.gmra.mxu1 %vm192_vm6, %v2689_v44 }
0x1682   :  { %2578 = vmatpush3.msra.mxu1 %v3049_v30  ;;  %2585 = vmatprep.mubr.msk.f32.mxu1 %vm2720_vm4, %v2718_v4 }
0x1683   :  { %2579 = vmatprep.subr.mxu1 %v2718_v4 }
0x1684   :  { %2580 = vmatpush3.msra.mxu1 %v3056_v31 }
0x1685   :  { %2581 = vmatprep.subr.mxu1 %v2718_v4 }
0x1686   :  { %2582 = vmatpush3.msra.mxu1 %v3061_v33 }
0x1687   :  { %2583 = vmatprep.subr.mxu1 %v2718_v4 }
0x1688   :  { %2584 = vmatpush3.msra.mxu1 %v3068_v34 }
0x1689   :  { %2599 = vmatprep.subr.mxu1 %v2718_v4 }
0x1741   :  { %v1482_v46 = vpop.f32.mrf.mxu1 }
0x1742   :  { %v1495_v47 = vadd.f32 %v3095_v45, %v1482_v46  ;;  %v1486_v39 = vadd.f32 %v1482_v46, %v3105_v51 }
0x1743   :  { %v2565_v48 = vpop.f32.mrf.mxu1 }
0x1744   :  { %1497 = vrot.lane.b32.xlu0 %v1495_v47, %s2719_s4  ;;  %v1487_v2 = vmul.f32 0.5, %v1486_v39 }
0x1746   :  { %2690 = vtanh.f32 %v1487_v2 }
0x1753   :  { %v2691_v52 = vpop.eup %2690 }
0x1754   :  { %v1489_v53 = vadd.f32 1.0, %v2691_v52 }
0x1756   :  { %v1490_v54 = vmul.f32 0.5, %v1489_v53 }
0x1758   :  { %v1507_v56 = vsub.f32 1.0, %v1490_v54 }
0x17b6   :  { %v1498_v0 = vpop.permute.xlu0 %1497 }
0x17b7   :  { %v1500_v55 = vmul.f32 %v1498_v0, %v1490_v54 }
0x17b9   :  { %1502 = vrot.lane.b32.xlu1 %v1500_v55, %s2719_s4 }
0x17bd   :  { %1513 = vrot.lane.b32.xlu1 %v2689_v44, %s2722_s12 }
0x17c1   :  { %1321 = vrot.lane.b32.xlu1 %v2758_v7, %s2719_s4 }
0x17c5   :  { %1319 = vrot.lane.b32.xlu1 %v2794_v16, %s2719_s4 }
0x182b   :  { %v1503_v6 = vpop.permute.xlu1 %1502 }
0x182c   :  { %v1505_v38 = vadd.f32 %v1503_v6, %v3105_v51 }
0x182e   :  { %2692 = vtanh.f32 %v1505_v38 }
0x182f   :  { %v1514_v7 = vpop.permute.xlu1 %1513 }
0x1830   :  { %v1516_v58 = vmul.f32 %v1514_v7, %v1490_v54 }
0x1833   :  { %v1322_v16 = vpop.permute.xlu1 %1321 }
0x183b   :  { %v2693_v61 = vpop.eup %2692 }
0x183c   :  { %1509 = vrot.lane.b32.xlu0 %v2693_v61, %s2721_s11 }
0x1840   :  { %1323 = vrot.lane.b32.xlu0 %v2788_v15, %s2719_s4  ;;  %v1320_v15 = vpop.permute.xlu1 %1319 }
0x1844   :  { %1243 = vrot.lane.b32.xlu0 %v3081_v36, %s2719_s4 }
0x1848   :  { %1317 = vrot.lane.b32.xlu0 %v2763_v8, %s2719_s4 }
0x18ae   :  { %v1510_v57 = vpop.permute.xlu0 %1509 }
0x18af   :  { %v1512_v59 = vmul.f32 %v1510_v57, %v1507_v56 }
0x18b1   :  { %v3122_v60 = vadd.f32 %v1516_v58, %v1512_v59 }
0x18b2   :  { %v1324_v62 = vpop.permute.xlu0 %1323 }
0x18b3   :  { %1519 = vrot.lane.b32.xlu1 %v3122_v60, %s2721_s11  ;;  %2545 = vmatpush3.msra.mxu0 %v1324_v62  ;;  %v1623_v35 = vrot.slane %v3122_v60, 4 }
0x18b4   :  { %2546 = vmatprep.subr.mxu0 %v2718_v4 }
0x18b5   :  { %2547 = vmatpush3.msra.mxu0 %v1322_v16 }
0x18b6   :  { %v1244_v5 = vpop.permute.xlu0 %1243  ;;  %2548 = vmatprep.subr.mxu0 %v2718_v4 }
0x18b7   :  { %v1313_v8 = vadd.f32 %v1312_v42, %v1244_v5  ;;  %2549 = vmatpush3.msra.mxu0 %v1320_v15 }
0x18b8   :  { %2550 = vmatprep.subr.mxu0 %v2718_v4 }
0x18b9   :  { %v1316_v9 = vmax.f32 %v1313_v8, 0.0 }
0x18ba   :  { %v1318_v32 = vpop.permute.xlu0 %1317 }
0x18bb   :  { %2551 = vmatpush3.msra.mxu0 %v1318_v32 }
0x18bc   :  { %2553 = vmatmul.mubr.msk.f32.vlgmr.msra.gmra.mxu0 %vm192_vm6, %v1316_v9  ;;  %2566 = vmatprep.subr.mxu0 %v2718_v4 }
0x18bd   :  { %2567 = vmatpush3.msra.mxu0 %v3049_v30  ;;  %2574 = vmatprep.mubr.msk.f32.mxu0 %vm2720_vm4, %v2718_v4 }
0x18be   :  { %2568 = vmatprep.subr.mxu0 %v2718_v4 }
0x18bf   :  { %2569 = vmatpush3.msra.mxu0 %v3056_v31 }
0x18c0   :  { %2570 = vmatprep.subr.mxu0 %v2718_v4 }
0x18c1   :  { %2571 = vmatpush3.msra.mxu0 %v3061_v33 }
0x18c2   :  { %2572 = vmatprep.subr.mxu0 %v2718_v4 }
0x18c3   :  { %2573 = vmatpush3.msra.mxu0 %v3068_v34 }
0x18c4   :  { %2588 = vmatprep.subr.mxu0 %v2718_v4 }
0x1925   :  { %v1520_v10 = vpop.permute.xlu1 %1519 }
0x1926   :  { %1523 = vst.msk [vmem:[#allocation2] sm:$0xf] %vm1522_vm8, %v1520_v10  ;;  %2575 = vmatmul.mubr.msk.f32.vlgmr.msra.gmra.mxu0 %vm192_vm6, %v1520_v10 }
0x1927   :  { %2589 = vmatpush3.msra.mxu0 %v3049_v30  ;;  %2596 = vmatprep.mubr.msk.f32.mxu0 %vm2720_vm4, %v2718_v4 }
0x1928   :  { %2590 = vmatprep.subr.mxu0 %v2718_v4 }
0x1929   :  { %2591 = vmatpush3.msra.mxu0 %v3056_v31 }
0x192a   :  { %2592 = vmatprep.subr.mxu0 %v2718_v4 }
0x192b   :  { %2593 = vmatpush3.msra.mxu0 %v3061_v33 }
0x192c   :  { %2594 = vmatprep.subr.mxu0 %v2718_v4 }
0x192d   :  { %2595 = vmatpush3.msra.mxu0 %v3068_v34 }
0x192e   :  { %2610 = vmatprep.subr.mxu0 %v2718_v4 }
0x197c   :  { %v3153_v13 = vpop.f32.mrf.mxu0 }
0x197e   :  { %v2554_v20 = vpop.f32.mrf.mxu0 }
0x19e6   :  { %v1592_v11 = vpop.f32.mrf.mxu0 }
0x19e7   :  { %v1604_v12 = vadd.f32 %v1592_v11, %v3095_v45  ;;  %v1597_v19 = vrot.slane %v1592_v11, 4 }
0x19e8   :  { %v2576_v14 = vpop.f32.mrf.mxu0 }
0x19e9   :  { %v1606_v17 = vrot.slane %v1604_v12, 4  ;;  %v1599_v21 = vadd.f32 %v1597_v19, %v3105_v51 }
0x19eb   :  { %1607 = vrot.lane.b32.xlu0 %v1606_v17, %s2719_s4  ;;  %v1600_v23 = vmul.f32 0.5, %v1599_v21 }
0x19ed   :  { %2694 = vtanh.f32 %v1600_v23 }
0x19fa   :  { %v2695_v24 = vpop.eup %2694 }
0x19fb   :  { %v1602_v25 = vadd.f32 1.0, %v2695_v24 }
0x19fd   :  { %v1603_v18 = vmul.f32 0.5, %v1602_v25 }
0x19ff   :  { %v1617_v37 = vsub.f32 1.0, %v1603_v18  ;;  %v1625_v41 = vmul.f32 %v1623_v35, %v1603_v18 }
0x1a5d   :  { %v1608_v22 = vpop.permute.xlu0 %1607 }
0x1a5e   :  { %v1610_v26 = vmul.f32 %v1608_v22, %v1603_v18 }
0x1a60   :  { %1612 = vrot.lane.b32.xlu1 %v1610_v26, %s2719_s4 }
0x1ad2   :  { %v1613_v27 = vpop.permute.xlu1 %1612 }
0x1ad3   :  { %v1615_v28 = vadd.f32 %v1613_v27, %v3105_v51  ;;  %v280_v51 = vadd.f32 %v2895_v63, %v3101_v50 }
0x1ad5   :  { %2696 = vtanh.f32 %v1615_v28 }
0x1ae2   :  { %v2697_v29 = vpop.eup %2696 }
0x1ae3   :  { %1619 = vrot.lane.b32.xlu0 %v2697_v29, %s2721_s11 }
0x1b55   :  { %v1620_v40 = vpop.permute.xlu0 %1619 }
0x1b56   :  { %v1622_v42 = vmul.f32 %v1620_v40, %v1617_v37  ;;  %v286_v37 = vadd.f32 %v2899_v1, %v3101_v50 }
0x1b58   :  { %v3162_v43 = vadd.f32 %v1625_v41, %v1622_v42 }
0x1b5a   :  { %v1633_v44 = vrot.slane %v3162_v43, 4 }
0x1b5c   :  { %1634 = vrot.lane.b32.xlu1 %v1633_v44, %s2721_s11 }
0x1bce   :  { %v1635_v46 = vpop.permute.xlu1 %1634 }
0x1bcf   :  { %2586 = vmatmul.mubr.msk.f32.vlgmr.msra.gmra.mxu1 %vm192_vm6, %v1635_v46 }
0x1bd0   :  { %2600 = vmatpush3.msra.mxu1 %v3049_v30  ;;  %2607 = vmatprep.mubr.msk.f32.mxu1 %vm2720_vm4, %v2718_v4 }
0x1bd1   :  { %2601 = vmatprep.subr.mxu1 %v2718_v4 }
0x1bd2   :  { %2602 = vmatpush3.msra.mxu1 %v3056_v31 }
0x1bd3   :  { %2603 = vmatprep.subr.mxu1 %v2718_v4 }
0x1bd4   :  { %2604 = vmatpush3.msra.mxu1 %v3061_v33 }
0x1bd5   :  { %2605 = vmatprep.subr.mxu1 %v2718_v4 }
0x1bd6   :  { %2606 = vmatpush3.msra.mxu1 %v3068_v34 }
0x1bd7   :  { %2621 = vmatprep.subr.mxu1 %v2718_v4 }
0x1c8f   :  { %v1704_v47 = vpop.f32.mrf.mxu1 }
0x1c90   :  { %v1713_v48 = vadd.f32 %v1704_v47, %v3095_v45  ;;  %v1708_v39 = vadd.f32 %v1704_v47, %v280_v51 }
0x1c91   :  { %v2587_v49 = vpop.f32.mrf.mxu1 }
0x1c92   :  { %1715 = vrot.lane.b32.xlu0 %v1713_v48, %s2719_s4  ;;  %v1709_v2 = vmul.f32 0.5, %v1708_v39 }
0x1c94   :  { %2698 = vtanh.f32 %v1709_v2 }
0x1ca1   :  { %v2699_v52 = vpop.eup %2698 }
0x1ca2   :  { %v1711_v53 = vadd.f32 1.0, %v2699_v52 }
0x1ca4   :  { %v1712_v54 = vmul.f32 0.5, %v1711_v53 }
0x1ca6   :  { %v1725_v7 = vsub.f32 1.0, %v1712_v54  ;;  %v1732_v57 = vmul.f32 %v1712_v54, %v1633_v44 }
0x1d04   :  { %v1716_v0 = vpop.permute.xlu0 %1715 }
0x1d05   :  { %v1718_v55 = vmul.f32 %v1716_v0, %v1712_v54 }
0x1d07   :  { %1720 = vrot.lane.b32.xlu1 %v1718_v55, %s2719_s4 }
0x1d79   :  { %v1721_v6 = vpop.permute.xlu1 %1720 }
0x1d7a   :  { %v1723_v38 = vadd.f32 %v1721_v6, %v280_v51 }
0x1d7c   :  { %2700 = vtanh.f32 %v1723_v38 }
0x1d89   :  { %v2701_v61 = vpop.eup %2700 }
0x1d8a   :  { %1727 = vrot.lane.b32.xlu0 %v2701_v61, %s2721_s11 }
0x1dfc   :  { %v1728_v56 = vpop.permute.xlu0 %1727 }
0x1dfd   :  { %v1730_v63 = vmul.f32 %v1728_v56, %v1725_v7 }
0x1dff   :  { %v1733_v16 = vadd.f32 %v1732_v57, %v1730_v63 }
0x1e01   :  { %1735 = vrot.lane.b32.xlu1 %v1733_v16, %s2721_s11  ;;  %v1838_v21 = vrot.slane %v1733_v16, 4 }
0x1e73   :  { %v1736_v58 = vpop.permute.xlu1 %1735 }
0x1e74   :  { %1738 = vst.msk [vmem:[#allocation2 + $0x8] sm:$0xf] %vm1522_vm8, %v1736_v58  ;;  %2597 = vmatmul.mubr.msk.f32.vlgmr.msra.gmra.mxu0 %vm192_vm6, %v1736_v58 }
0x1e75   :  { %2611 = vmatpush3.msra.mxu0 %v3049_v30  ;;  %2618 = vmatprep.mubr.msk.f32.mxu0 %vm2720_vm4, %v2718_v4 }
0x1e76   :  { %2612 = vmatprep.subr.mxu0 %v2718_v4 }
0x1e77   :  { %2613 = vmatpush3.msra.mxu0 %v3056_v31 }
0x1e78   :  { %2614 = vmatprep.subr.mxu0 %v2718_v4 }
0x1e79   :  { %2615 = vmatpush3.msra.mxu0 %v3061_v33 }
0x1e7a   :  { %2616 = vmatprep.subr.mxu0 %v2718_v4 }
0x1e7b   :  { %2617 = vmatpush3.msra.mxu0 %v3068_v34 }
0x1f34   :  { %v1807_v59 = vpop.f32.mrf.mxu0 }
0x1f35   :  { %v1819_v60 = vadd.f32 %v1807_v59, %v3095_v45  ;;  %v1812_v5 = vrot.slane %v1807_v59, 4 }
0x1f36   :  { %v2598_v62 = vpop.f32.mrf.mxu0 }
0x1f37   :  { %v1821_v15 = vrot.slane %v1819_v60, 4  ;;  %v1814_v8 = vadd.f32 %v1812_v5, %v280_v51 }
0x1f39   :  { %1822 = vrot.lane.b32.xlu0 %v1821_v15, %s2719_s4  ;;  %v1815_v9 = vmul.f32 0.5, %v1814_v8 }
0x1f3b   :  { %2702 = vtanh.f32 %v1815_v9 }
0x1f48   :  { %v2703_v32 = vpop.eup %2702 }
0x1f49   :  { %v1817_v10 = vadd.f32 1.0, %v2703_v32 }
0x1f4b   :  { %v1818_v20 = vmul.f32 0.5, %v1817_v10 }
0x1f4d   :  { %v1832_v23 = vsub.f32 1.0, %v1818_v20  ;;  %v1840_v18 = vmul.f32 %v1838_v21, %v1818_v20  ;;  %v292_v21 = vadd.f32 %v2903_v3, %v3101_v50 }
0x1fab   :  { %v1823_v11 = vpop.permute.xlu0 %1822 }
0x1fac   :  { %v1825_v12 = vmul.f32 %v1823_v11, %v1818_v20 }
0x1fae   :  { %1827 = vrot.lane.b32.xlu1 %v1825_v12, %s2719_s4 }
0x2020   :  { %v1828_v14 = vpop.permute.xlu1 %1827 }
0x2021   :  { %v1830_v17 = vadd.f32 %v1828_v14, %v280_v51 }
0x2023   :  { %2704 = vtanh.f32 %v1830_v17 }
0x2030   :  { %v2705_v19 = vpop.eup %2704 }
0x2031   :  { %1834 = vrot.lane.b32.xlu0 %v2705_v19, %s2721_s11 }
0x20a3   :  { %v1835_v24 = vpop.permute.xlu0 %1834 }
0x20a4   :  { %v1837_v25 = vmul.f32 %v1835_v24, %v1832_v23 }
0x20a6   :  { %v3199_v22 = vadd.f32 %v1840_v18, %v1837_v25 }
0x20a8   :  { %v1847_v26 = vrot.slane %v3199_v22, 4 }
0x20aa   :  { %1848 = vrot.lane.b32.xlu1 %v1847_v26, %s2721_s11 }
0x211c   :  { %v1849_v27 = vpop.permute.xlu1 %1848 }
0x211d   :  { %2608 = vmatmul.mubr.msk.f32.vlgmr.msra.gmra.mxu1 %vm192_vm6, %v1849_v27 }
0x211e   :  { %2622 = vmatpush3.msra.mxu1 %v3049_v30  ;;  %2629 = vmatprep.mubr.msk.f32.mxu1 %vm2720_vm4, %v2718_v4 }
0x211f   :  { %2623 = vmatprep.subr.mxu1 %v2718_v4 }
0x2120   :  { %2624 = vmatpush3.msra.mxu1 %v3056_v31 }
0x2121   :  { %2625 = vmatprep.subr.mxu1 %v2718_v4 }
0x2122   :  { %2626 = vmatpush3.msra.mxu1 %v3061_v33 }
0x2123   :  { %2627 = vmatprep.subr.mxu1 %v2718_v4 }
0x2124   :  { %2628 = vmatpush3.msra.mxu1 %v3068_v34 }
0x21dd   :  { %v1918_v28 = vpop.f32.mrf.mxu1 }
0x21de   :  { %v1927_v29 = vadd.f32 %v1918_v28, %v3095_v45  ;;  %v1922_v40 = vadd.f32 %v1918_v28, %v286_v37 }
0x21df   :  { %v2609_v35 = vpop.f32.mrf.mxu1 }
0x21e0   :  { %1929 = vrot.lane.b32.xlu0 %v1927_v29, %s2719_s4  ;;  %v1923_v41 = vmul.f32 0.5, %v1922_v40 }
0x21e2   :  { %2706 = vtanh.f32 %v1923_v41 }
0x21ef   :  { %v2707_v42 = vpop.eup %2706 }
0x21f0   :  { %v1925_v44 = vadd.f32 1.0, %v2707_v42 }
0x21f2   :  { %v1926_v46 = vmul.f32 0.5, %v1925_v44 }
0x21f4   :  { %v1939_v39 = vsub.f32 1.0, %v1926_v46  ;;  %v1946_v52 = vmul.f32 %v1926_v46, %v1847_v26 }
0x2252   :  { %v1930_v47 = vpop.permute.xlu0 %1929 }
0x2253   :  { %v1932_v48 = vmul.f32 %v1930_v47, %v1926_v46 }
0x2255   :  { %1934 = vrot.lane.b32.xlu1 %v1932_v48, %s2719_s4 }
0x22c7   :  { %v1935_v4 = vpop.permute.xlu1 %1934 }
0x22c8   :  { %v1937_v49 = vadd.f32 %v1935_v4, %v286_v37 }
0x22ca   :  { %2708 = vtanh.f32 %v1937_v49 }
0x22d7   :  { %v2709_v51 = vpop.eup %2708 }
0x22d8   :  { %1941 = vrot.lane.b32.xlu0 %v2709_v51, %s2721_s11 }
0x234a   :  { %v1942_v2 = vpop.permute.xlu0 %1941 }
0x234b   :  { %v1944_v1 = vmul.f32 %v1942_v2, %v1939_v39 }
0x234d   :  { %v1947_v53 = vadd.f32 %v1946_v52, %v1944_v1 }
0x234f   :  { %1949 = vrot.lane.b32.xlu1 %v1947_v53, %s2721_s11  ;;  %v2052_v5 = vrot.slane %v1947_v53, 4 }
0x23c1   :  { %v1950_v54 = vpop.permute.xlu1 %1949 }
0x23c2   :  { %1952 = vst.msk [vmem:[#allocation2 + $0x10] sm:$0xf] %vm1522_vm8, %v1950_v54  ;;  %2619 = vmatmul.mubr.msk.f32.vlgmr.msra.gmra.mxu0 %vm192_vm6, %v1950_v54 }
0x2482   :  { %v2021_v0 = vpop.f32.mrf.mxu0 }
0x2483   :  { %v2033_v55 = vadd.f32 %v2021_v0, %v3095_v45  ;;  %v2026_v61 = vrot.slane %v2021_v0, 4 }
0x2484   :  { %v2620_v6 = vpop.f32.mrf.mxu0 }
0x2485   :  { %v2035_v38 = vrot.slane %v2033_v55, 4  ;;  %v2028_v7 = vadd.f32 %v2026_v61, %v286_v37 }
0x2487   :  { %2036 = vrot.lane.b32.xlu0 %v2035_v38, %s2719_s4  ;;  %v2029_v56 = vmul.f32 0.5, %v2028_v7 }
0x2489   :  { %2710 = vtanh.f32 %v2029_v56 }
0x2496   :  { %v2711_v57 = vpop.eup %2710 }
0x2497   :  { %v2031_v63 = vadd.f32 1.0, %v2711_v57 }
0x2499   :  { %v2032_v16 = vmul.f32 0.5, %v2031_v63 }
0x249b   :  { %v2046_v8 = vsub.f32 1.0, %v2032_v16  ;;  %v2054_v10 = vmul.f32 %v2052_v5, %v2032_v16 }
0x24f9   :  { %v2037_v58 = vpop.permute.xlu0 %2036 }
0x24fa   :  { %v2039_v59 = vmul.f32 %v2037_v58, %v2032_v16 }
0x24fc   :  { %2041 = vrot.lane.b32.xlu1 %v2039_v59, %s2719_s4 }
0x256e   :  { %v2042_v60 = vpop.permute.xlu1 %2041 }
0x256f   :  { %v2044_v62 = vadd.f32 %v2042_v60, %v286_v37 }
0x2571   :  { %2712 = vtanh.f32 %v2044_v62 }
0x257e   :  { %v2713_v15 = vpop.eup %2712 }
0x257f   :  { %2048 = vrot.lane.b32.xlu0 %v2713_v15, %s2721_s11 }
0x25f1   :  { %v2049_v9 = vpop.permute.xlu0 %2048 }
0x25f2   :  { %v2051_v32 = vmul.f32 %v2049_v9, %v2046_v8 }
0x25f4   :  { %v2055_v20 = vadd.f32 %v2054_v10, %v2051_v32 }
0x25f6   :  { %v2061_v11 = vrot.slane %v2055_v20, 4 }
0x25f8   :  { %2062 = vrot.lane.b32.xlu1 %v2061_v11, %s2721_s11 }
0x266a   :  { %v2063_v12 = vpop.permute.xlu1 %2062 }
0x266b   :  { %2630 = vmatmul.mubr.msk.f32.vlgmr.msra.gmra.mxu1 %vm192_vm6, %v2063_v12 }
0x272b   :  { %v2132_v14 = vpop.f32.mrf.mxu1 }
0x272c   :  { %v2141_v17 = vadd.f32 %v2132_v14, %v3095_v45  ;;  %v2136_v23 = vadd.f32 %v2132_v14, %v292_v21 }
0x272d   :  { %v2631_v19 = vpop.f32.mrf.mxu1 }
0x272e   :  { %2143 = vrot.lane.b32.xlu0 %v2141_v17, %s2719_s4  ;;  %v2137_v24 = vmul.f32 0.5, %v2136_v23 }
0x2730   :  { %2714 = vtanh.f32 %v2137_v24 }
0x273d   :  { %v2715_v25 = vpop.eup %2714 }
0x273e   :  { %v2139_v18 = vadd.f32 1.0, %v2715_v25 }
0x2740   :  { %v2140_v26 = vmul.f32 0.5, %v2139_v18 }
0x2742   :  { %v2153_v41 = vsub.f32 1.0, %v2140_v26  ;;  %v2160_v44 = vmul.f32 %v2140_v26, %v2061_v11 }
0x27a0   :  { %v2144_v27 = vpop.permute.xlu0 %2143 }
0x27a1   :  { %v2146_v28 = vmul.f32 %v2144_v27, %v2140_v26 }
0x27a3   :  { %2148 = vrot.lane.b32.xlu1 %v2146_v28, %s2719_s4 }
0x27a7   :  { %1628 = vrot.lane.b32.xlu1 %v3162_v43, %s2721_s11 }
0x27ab   :  { %2186 = vrot.lane.b32.xlu1 %v3049_v30, %s2722_s12 }
0x27af   :  { %2057 = vrot.lane.b32.xlu1 %v2055_v20, %s2721_s11 }
0x27b3   :  { %2182 = vrot.lane.b32.xlu1 %v3061_v33, %s2722_s12 }
0x27b7   :  { %1329 = vrot.lane.b32.xlu1 %v3081_v36, %s2722_s12 }
0x2815   :  { %v2149_v3 = vpop.permute.xlu1 %2148 }
0x2816   :  { %v2151_v45 = vadd.f32 %v2149_v3, %v292_v21 }
0x2818   :  { %2716 = vtanh.f32 %v2151_v45 }
0x2819   :  { %v1629_v50 = vpop.permute.xlu1 %1628 }
0x281a   :  { %1632 = vst.msk [vmem:[#allocation2] sm:$0xf0] %vm1631_vm9, %v1629_v50 }
0x281d   :  { %v2187_v29 = vpop.permute.xlu1 %2186 }
0x281e   :  { %2632 = vmatprep.subr.mxu0 %v2187_v29 }
0x281f   :  { %2633 = vmatpush3.msra.mxu0 %v2187_v29 }
0x2821   :  { %v2058_v43 = vpop.permute.xlu1 %2057  ;;  %v2172_v30 = vld [vmem:[#allocation2] sm:$0xff] }
0x2822   :  { %2060 = vst.msk [vmem:[#allocation2 + $0x10] sm:$0xf0] %vm1631_vm9, %v2058_v43  ;;  %2640 = vmatprep.mubr.msk.f32.mxu0 %vm192_vm6, %v2172_v30 }
0x2825   :  { %v2717_v33 = vpop.eup %2716  ;;  %v2183_v35 = vpop.permute.xlu1 %2182 }
0x2826   :  { %2155 = vrot.lane.b32.xlu0 %v2717_v33, %s2721_s11 }
0x2829   :  { %v1330_v37 = vpop.permute.xlu1 %1329  ;;  %v2174_v51 = vld [vmem:[#allocation2 + $0x10] sm:$0xff] }
0x282a   :  { %v1402_v40 = vadd.f32 %v3153_v13, %v1330_v37  ;;  %1843 = vrot.lane.b32.xlu0 %v3199_v22, %s2721_s11 }
0x282c   :  { %1408 = vrot.lane.b32.xlu1 %v1402_v40, %s2723_s1 }
0x282e   :  { %2184 = vrot.lane.b32.xlu0 %v3056_v31, %s2722_s12 }
0x2898   :  { %v2156_v42 = vpop.permute.xlu0 %2155 }
0x2899   :  { %v2158_v46 = vmul.f32 %v2156_v42, %v2153_v41 }
0x289b   :  { %v2161_v47 = vadd.f32 %v2160_v44, %v2158_v46 }
0x289c   :  { %v1844_v48 = vpop.permute.xlu0 %1843 }
0x289d   :  { %1846 = vst.msk [vmem:[#allocation2 + $0x8] sm:$0xf0] %vm1631_vm9, %v1844_v48  ;;  %2163 = vrot.lane.b32.xlu0 %v2161_v47, %s2721_s11 }
0x289e   :  { %v1409_v13 = vpop.permute.xlu1 %1408 }
0x289f   :  { %1412 = vst.msk [vmem:[%s3282_s2 + $0x1c] sm:$0xf] %vm1411_vm10, %v1409_v13 }
0x28a0   :  { %v2185_v22 = vpop.permute.xlu0 %2184 }
0x28a1   :  { %2180 = vrot.lane.b32.xlu0 %v3068_v34, %s2722_s12  ;;  %2634 = vmatprep.subr.mxu0 %v2185_v22 }
0x28a2   :  { %2635 = vmatpush3.msra.mxu0 %v2185_v22 }
0x28a3   :  { %2636 = vmatprep.subr.mxu0 %v2183_v35 }
0x28a4   :  { %2637 = vmatpush3.msra.mxu0 %v2183_v35  ;;  %v2173_v49 = vld [vmem:[#allocation2 + $0x8] sm:$0xff] }
0x28a5   :  { %2193 = vrot.lane.b32.xlu0 %v3081_v36, %s2721_s11 }
0x290f   :  { %v2164_v31 = vpop.permute.xlu0 %2163 }
0x2910   :  { %2166 = vst.msk [vmem:[#allocation2 + $0x18] sm:$0xf] %vm1522_vm8, %v2164_v31 }
0x2913   :  { %v2181_v4 = vpop.permute.xlu0 %2180 }
0x2914   :  { %2638 = vmatprep.subr.mxu0 %v2181_v4 }
0x2915   :  { %2639 = vmatpush3.msra.mxu0 %v2181_v4 }
0x2916   :  { %2641 = vmatmul.mubr.msk.f32.vlgmr.msra.gmra.mxu0 %vm192_vm6, %v2173_v49 }
0x2917   :  { %2643 = vmatprep.mubr.msk.f32.mxu0 %vm192_vm6, %v2174_v51  ;;  %v2175_v34 = vld [vmem:[#allocation2 + $0x18] sm:$0xf]  ;;  %v2194_v39 = vpop.permute.xlu0 %2193 }
0x291a   :  { %2644 = vmatmul.mubr.msk.f32.gmra.mxu0 %vm192_vm6, %v2175_v34 }
0x29d6   :  { %v2642_v2 = vpop.f32.mrf.mxu0 }
0x29d7   :  { %v2280_v52 = vadd.f32 %v2642_v2, %v2194_v39 }
0x29d8   :  { %v2274_v1 = vpop.f32.mrf.mxu0 }
0x29d9   :  { %2294 = vst.msk [vmem:[%s3282_s2 + $0x8] sm:$0xff] %vm192_vm6, %v2280_v52  ;;  %v2275_v36 = vadd.f32 %v2274_v1, %v2194_v39 }
0x29da   :  { %v2645_v53 = vpop.f32.mrf.mxu0 }
0x29db   :  { %2293 = vst.msk [vmem:[%s3282_s2] sm:$0xff] %vm192_vm6, %v2275_v36  ;;  %v2290_v54 = vadd.f32 %v2645_v53, %v2194_v39 }
0x29dc   :  { %v2284_v0 = vpop.f32.mrf.mxu0 }
0x29dd   :  { %2296 = vst.msk [vmem:[%s3282_s2 + $0x18] sm:$0xf] %vm1522_vm8, %v2290_v54  ;;  %v2285_v55 = vadd.f32 %v2284_v0, %v2194_v39 }
0x29df   :  { %2295 = vst.msk [vmem:[%s3282_s2 + $0x10] sm:$0xff] %vm192_vm6, %v2285_v55 }

</bundles_post_ra>
